<compile_context>
chip_gen: v7x
topology: tpu7x:2x2x1
jax: 0.10.0
libtpu: 0.0.40
codegen_flags: <defaults>
</compile_context>

<pallas_src>
import functools

import jax
import jax.numpy as jnp
from jax.experimental import pallas as pl
from jax.experimental.pallas import tpu as pltpu

LATENT_DIM = 128
NUM_MIX = 5
EMB_DIM = LATENT_DIM            # module sets self.embedding_dim = latent_dim
ML = NUM_MIX * LATENT_DIM       # 640 (flattened mu / logvar width)
LOGIT_PAD = 128                 # mixture logits padded to one full lane tile
HEAD_W = 2 * ML + LOGIT_PAD     # 1408 = [mu | logvar | padded logits]
NEG_BIG = -1e30                 # bias pad for fake logit columns (-> softmax weight 0)

# decoder: 128 -> 256 -> 256 -> 128 -> 128 -> 64 -> 64 -> 128 (ReLU between all but last)
DEC_DIMS = [(EMB_DIM, 256), (256, 256), (256, 128), (128, 128),
            (128, 64), (64, 64), (64, EMB_DIM)]
N_DEC = len(DEC_DIMS)
DEC_W = 256                     # every decoder layer zero-padded to 256x256


def vae_kernel(emb_ref, eps_ref, wenc_ref, benc_ref, decw_ref, decb_ref,
               recon_ref, mu_ref, lv_ref, wts_ref, z_ref):
    x = emb_ref[...]                                          # [TB, 128] f32

    # --- fused encoder heads: one bf16 MXU matmul, f32 accumulation -----------
    heads = jnp.dot(x.astype(jnp.bfloat16), wenc_ref[...],
                    preferred_element_type=jnp.float32)
    heads = heads + benc_ref[...]                             # [TB, 1408]

    mu_flat = heads[:, :ML]                                   # [TB, 640]
    lv_flat = heads[:, ML:2 * ML]                             # [TB, 640]
    logits = heads[:, 2 * ML:]                                # [TB, 128]; cols>=5 ~ -1e30

    # softmax over the full 128 lanes; the padded columns underflow to exp()=0
    logits = logits - jnp.max(logits, axis=-1, keepdims=True)
    ex = jnp.exp(logits)
    wts = ex / jnp.sum(ex, axis=-1, keepdims=True)            # [TB, 128] (real cols 0..4)

    mu_ref[...] = mu_flat
    lv_ref[...] = lv_flat
    wts_ref[...] = wts

    # --- reparameterize (vectorized over the whole [TB, 640] slab, f32) -------
    sigma = jnp.exp(0.5 * lv_flat)
    z_all = mu_flat + sigma * eps_ref[...]                    # [TB, 640]
    z = wts[:, 0:1] * z_all[:, :LATENT_DIM]
    for m in range(1, NUM_MIX):
        z = z + wts[:, m:m + 1] * z_all[:, m * LATENT_DIM:(m + 1) * LATENT_DIM]
    z_ref[...] = z

    # --- decoder: 7 zero-padded 256-wide layers (bf16 MXU, f32 elementwise) ---
    w0 = decw_ref[0]                                          # [256, 256] bf16
    h = jnp.dot(z.astype(jnp.bfloat16), w0[:LATENT_DIM, :],
                preferred_element_type=jnp.float32)
    h = jnp.maximum(h + decb_ref[0:1, :], 0.0)
    for li in range(1, N_DEC):
        h = jnp.dot(h.astype(jnp.bfloat16), decw_ref[li],
                    preferred_element_type=jnp.float32)
        h = h + decb_ref[li:li + 1, :]
        if li < N_DEC - 1:
            h = jnp.maximum(h, 0.0)
    recon_ref[...] = h[:, :EMB_DIM]


def make_params(key):
    """Deterministic xavier-normal weights (W stored as [in, out]), zero biases."""
    def xavier(k, fi, fo):
        std = (2.0 / (fi + fo)) ** 0.5
        return jax.random.normal(k, (fi, fo), jnp.float32) * std

    keys = jax.random.split(key, 3 + N_DEC)
    params = []
    params += [xavier(keys[0], EMB_DIM, ML), jnp.zeros((1, ML), jnp.float32)]            # fc_mu
    params += [xavier(keys[1], EMB_DIM, ML), jnp.zeros((1, ML), jnp.float32)]            # fc_logvar
    params += [xavier(keys[2], EMB_DIM, NUM_MIX), jnp.zeros((1, NUM_MIX), jnp.float32)]  # fc_weights
    for i, (fi, fo) in enumerate(DEC_DIMS):
        params += [xavier(keys[3 + i], fi, fo), jnp.zeros((1, fo), jnp.float32)]
    return params


def pack_params(params):
    """Pack the 20 nn.Linear tensors into 4 lane-padded slabs (bf16 weights)."""
    wmu, bmu, wlv, blv, ww, bw, *dec = params

    ww_pad = jnp.zeros((EMB_DIM, LOGIT_PAD), jnp.float32).at[:, :NUM_MIX].set(ww)
    bw_pad = jnp.full((1, LOGIT_PAD), NEG_BIG, jnp.float32).at[:, :NUM_MIX].set(bw)
    w_enc = jnp.concatenate([wmu, wlv, ww_pad], axis=1).astype(jnp.bfloat16)  # [128, 1408]
    b_enc = jnp.concatenate([bmu, blv, bw_pad], axis=1)                       # [1, 1408] f32

    dec_w = jnp.zeros((N_DEC, DEC_W, DEC_W), jnp.float32)
    dec_b = jnp.zeros((N_DEC, DEC_W), jnp.float32)
    for li, (fi, fo) in enumerate(DEC_DIMS):
        dec_w = dec_w.at[li, :fi, :fo].set(dec[2 * li])
        dec_b = dec_b.at[li, :fo].set(dec[2 * li + 1][0])
    return w_enc, b_enc, dec_w.astype(jnp.bfloat16), dec_b


def _round_up(x, m):
    return (x + m - 1) // m * m


@functools.partial(jax.jit, static_argnames=("tb",))
def vae_forward(emb, eps, w_enc, b_enc, dec_w, dec_b, tb=128):
    B = emb.shape[0]
    TB = min(tb, _round_up(B, 8))            # sublane-aligned batch tile
    Bp = _round_up(B, TB)
    if Bp != B:
        emb = jnp.pad(emb, ((0, Bp - B), (0, 0)))
        eps = jnp.pad(eps, ((0, Bp - B), (0, 0)))
    grid = (Bp // TB,)

    def batch_spec(w):
        return pl.BlockSpec((TB, w), lambda i: (i, 0))

    def const2(shape):
        return pl.BlockSpec(shape, lambda i: (0, 0))

    def const3(shape):
        return pl.BlockSpec(shape, lambda i: (0, 0, 0))

    out_shape = (
        jax.ShapeDtypeStruct((Bp, EMB_DIM), jnp.float32),     # recon
        jax.ShapeDtypeStruct((Bp, ML), jnp.float32),          # mu (flat)
        jax.ShapeDtypeStruct((Bp, ML), jnp.float32),          # logvar (flat)
        jax.ShapeDtypeStruct((Bp, LOGIT_PAD), jnp.float32),   # mixture weights (lane-padded)
        jax.ShapeDtypeStruct((Bp, LATENT_DIM), jnp.float32),  # z
    )

    recon, mu_flat, lv_flat, wts_pad, z = pl.pallas_call(
        vae_kernel,
        out_shape=out_shape,
        grid=grid,
        in_specs=[
            batch_spec(EMB_DIM),          # emb
            batch_spec(ML),               # eps
            const2(w_enc.shape),          # fused encoder-head weights (bf16)
            const2(b_enc.shape),          # fused encoder-head biases (f32)
            const3(dec_w.shape),          # decoder weight slab (bf16)
            const2(dec_b.shape),          # decoder bias slab (f32)
        ],
        out_specs=(
            batch_spec(EMB_DIM),
            batch_spec(ML),
            batch_spec(ML),
            batch_spec(LOGIT_PAD),
            batch_spec(LATENT_DIM),
        ),
        compiler_params=pltpu.CompilerParams(
            dimension_semantics=("parallel",)),
    )(emb, eps, w_enc, b_enc, dec_w, dec_b)

    mu = mu_flat[:B].reshape(B, NUM_MIX, LATENT_DIM)
    logvar = lv_flat[:B].reshape(B, NUM_MIX, LATENT_DIM)
    return recon[:B], mu, logvar, wts_pad[:B, :NUM_MIX], z[:B]


def ref_forward(emb, eps, params):
    """Pure-JAX reference mirroring the PyTorch forward (same bf16-operand /
    f32-accumulate matmul numerics as the kernel)."""
    wmu, bmu, wlv, blv, ww, bw, *dec = params

    def mm(a, w):
        return jnp.dot(a.astype(jnp.bfloat16), w.astype(jnp.bfloat16),
                       preferred_element_type=jnp.float32)

    B = emb.shape[0]
    mu = (mm(emb, wmu) + bmu).reshape(B, NUM_MIX, LATENT_DIM)
    logvar = (mm(emb, wlv) + blv).reshape(B, NUM_MIX, LATENT_DIM)
    wts = jax.nn.softmax(mm(emb, ww) + bw, axis=-1)
    e = eps.reshape(B, NUM_MIX, LATENT_DIM)
    z_i = mu + jnp.exp(0.5 * logvar) * e
    z = jnp.sum(wts[:, :, None] * z_i, axis=1)
    h = z
    for li in range(N_DEC):
        h = mm(h, dec[2 * li]) + dec[2 * li + 1]
        if li < N_DEC - 1:
            h = jnp.maximum(h, 0.0)
    return h, mu, logvar, wts, z


if __name__ == "__main__":
    key = jax.random.PRNGKey(0)
    k_param, k_emb, k_eps = jax.random.split(key, 3)

    B = 8
    params = make_params(k_param)
    packed = pack_params(params)

    # TODO(synk): SentenceTransformer.encode() runs outside Pallas; its output
    # embedding is fed to the kernel. eps is the reparameterization noise
    # (torch.randn in the reference), drawn deterministically here.
    emb = jax.random.normal(k_emb, (B, EMB_DIM), jnp.float32)
    eps = jax.random.normal(k_eps, (B, ML), jnp.float32)

    outs = jax.block_until_ready(vae_forward(emb, eps, *packed))
    recon, mu, logvar, wts, z = outs

    r_recon, r_mu, r_lv, r_wts, r_z = ref_forward(emb, eps, params)
    assert jnp.allclose(mu, r_mu, atol=1e-2, rtol=1e-2)
    assert jnp.allclose(logvar, r_lv, atol=1e-2, rtol=1e-2)
    assert jnp.allclose(wts, r_wts, atol=1e-2, rtol=1e-2)
    assert jnp.allclose(z, r_z, atol=1e-2, rtol=1e-2)
    assert jnp.allclose(recon, r_recon, atol=2e-2, rtol=2e-2)

    print("KERNEL_OK")
</pallas_src>

<mosaic_0001>
module attributes {stable_mosaic.version = 11 : i64} {
  func.func @vae_kernel(%arg0: i32, %arg1: memref<8x128xf32, #tpu.memory_space<vmem>>, %arg2: memref<8x640xf32, #tpu.memory_space<vmem>>, %arg3: memref<128x1408xbf16, #tpu.memory_space<vmem>>, %arg4: memref<1x1408xf32, #tpu.memory_space<vmem>>, %arg5: memref<7x256x256xbf16, #tpu.memory_space<vmem>>, %arg6: memref<7x256xf32, #tpu.memory_space<vmem>>, %arg7: memref<8x128xf32, #tpu.memory_space<vmem>>, %arg8: memref<8x640xf32, #tpu.memory_space<vmem>>, %arg9: memref<8x640xf32, #tpu.memory_space<vmem>>, %arg10: memref<8x128xf32, #tpu.memory_space<vmem>>, %arg11: memref<8x128xf32, #tpu.memory_space<vmem>>) attributes {dimension_semantics = [#tpu.dimension_semantics<parallel>], iteration_bounds = array<i64: 1>, scalar_prefetch = 0 : i64, scratch_operands = 0 : i64, tpu.core_type = #tpu.core_type<tc>, window_params = [{transform_indices = @transform_0, window_bounds = array<i64: 8, 128>}, {transform_indices = @transform_1, window_bounds = array<i64: 8, 640>}, {pipeline_mode = #tpu.pipeline_mode<synchronous>, transform_indices = @transform_2, window_bounds = array<i64: 128, 1408>}, {pipeline_mode = #tpu.pipeline_mode<synchronous>, transform_indices = @transform_3, window_bounds = array<i64: 1, 1408>}, {pipeline_mode = #tpu.pipeline_mode<synchronous>, transform_indices = @transform_4, window_bounds = array<i64: 7, 256, 256>}, {pipeline_mode = #tpu.pipeline_mode<synchronous>, transform_indices = @transform_5, window_bounds = array<i64: 7, 256>}, {transform_indices = @transform_6, window_bounds = array<i64: 8, 128>}, {transform_indices = @transform_7, window_bounds = array<i64: 8, 640>}, {transform_indices = @transform_8, window_bounds = array<i64: 8, 640>}, {transform_indices = @transform_9, window_bounds = array<i64: 8, 128>}, {transform_indices = @transform_10, window_bounds = array<i64: 8, 128>}]} {
    %c0 = arith.constant 0 : index
    %c0_0 = arith.constant 0 : index
    %0 = vector.load %arg1[%c0, %c0_0] : memref<8x128xf32, #tpu.memory_space<vmem>>, vector<8x128xf32>
    %1 = arith.truncf %0 : vector<8x128xf32> to vector<8x128xbf16>
    %c0_1 = arith.constant 0 : index
    %c0_2 = arith.constant 0 : index
    %2 = vector.load %arg3[%c0_1, %c0_2] : memref<128x1408xbf16, #tpu.memory_space<vmem>>, vector<128x1408xbf16>
    %cst = arith.constant dense<0.000000e+00> : vector<8x1408xf32>
    %3 = tpu.matmul %1, %2, %cst {dimension_numbers = #tpu.dot_dimension_numbers<[1], [0], [0], [1], [0, 0, 1, 1], [], []>} : vector<8x128xbf16>, vector<128x1408xbf16>, vector<8x1408xf32> -> vector<8x1408xf32>
    %c0_3 = arith.constant 0 : index
    %c0_4 = arith.constant 0 : index
    %4 = vector.load %arg4[%c0_3, %c0_4] : memref<1x1408xf32, #tpu.memory_space<vmem>>, vector<1x1408xf32>
    %5 = vector.broadcast %4 : vector<1x1408xf32> to vector<8x1408xf32>
    %6 = arith.addf %3, %5 : vector<8x1408xf32>
    %7 = vector.extract_strided_slice %6 {offsets = [0, 0], sizes = [8, 640], strides = [1, 1]} : vector<8x1408xf32> to vector<8x640xf32>
    %8 = vector.extract_strided_slice %6 {offsets = [0, 640], sizes = [8, 640], strides = [1, 1]} : vector<8x1408xf32> to vector<8x640xf32>
    %9 = vector.extract_strided_slice %6 {offsets = [0, 1280], sizes = [8, 128], strides = [1, 1]} : vector<8x1408xf32> to vector<8x128xf32>
    %cst_5 = arith.constant dense<0xFF800000> : vector<8xf32>
    %10 = vector.multi_reduction <maximumf>, %9, %cst_5 [1] : vector<8x128xf32> to vector<8xf32>
    %11 = vector.shape_cast %10 : vector<8xf32> to vector<8x1xf32>
    %12 = vector.broadcast %11 : vector<8x1xf32> to vector<8x128xf32>
    %13 = arith.subf %9, %12 : vector<8x128xf32>
    %14 = math.exp %13 : vector<8x128xf32>
    %cst_6 = arith.constant dense<0.000000e+00> : vector<8xf32>
    %15 = vector.multi_reduction <add>, %14, %cst_6 [1] : vector<8x128xf32> to vector<8xf32>
    %16 = vector.shape_cast %15 : vector<8xf32> to vector<8x1xf32>
    %17 = vector.broadcast %16 : vector<8x1xf32> to vector<8x128xf32>
    %18 = arith.divf %14, %17 : vector<8x128xf32>
    %c0_7 = arith.constant 0 : index
    %c0_8 = arith.constant 0 : index
    %19 = vector.load %arg8[%c0_7, %c0_8] : memref<8x640xf32, #tpu.memory_space<vmem>>, vector<8x640xf32>
    tpu.vector_store %arg8[%c0_7, %c0_8], %7 {strides = array<i32>} : memref<8x640xf32, #tpu.memory_space<vmem>>, vector<8x640xf32>,
    %c0_9 = arith.constant 0 : index
    %c0_10 = arith.constant 0 : index
    %20 = vector.load %arg9[%c0_9, %c0_10] : memref<8x640xf32, #tpu.memory_space<vmem>>, vector<8x640xf32>
    tpu.vector_store %arg9[%c0_9, %c0_10], %8 {strides = array<i32>} : memref<8x640xf32, #tpu.memory_space<vmem>>, vector<8x640xf32>,
    %c0_11 = arith.constant 0 : index
    %c0_12 = arith.constant 0 : index
    %21 = vector.load %arg10[%c0_11, %c0_12] : memref<8x128xf32, #tpu.memory_space<vmem>>, vector<8x128xf32>
    tpu.vector_store %arg10[%c0_11, %c0_12], %18 {strides = array<i32>} : memref<8x128xf32, #tpu.memory_space<vmem>>, vector<8x128xf32>,
    %cst_13 = arith.constant 5.000000e-01 : f32
    %22 = vector.broadcast %cst_13 : f32 to vector<8x640xf32>
    %23 = arith.mulf %22, %8 : vector<8x640xf32>
    %24 = math.exp %23 : vector<8x640xf32>
    %c0_14 = arith.constant 0 : index
    %c0_15 = arith.constant 0 : index
    %25 = vector.load %arg2[%c0_14, %c0_15] : memref<8x640xf32, #tpu.memory_space<vmem>>, vector<8x640xf32>
    %26 = arith.mulf %24, %25 : vector<8x640xf32>
    %27 = arith.addf %7, %26 : vector<8x640xf32>
    %28 = vector.extract_strided_slice %18 {offsets = [0, 0], sizes = [8, 1], strides = [1, 1]} : vector<8x128xf32> to vector<8x1xf32>
    %29 = vector.extract_strided_slice %27 {offsets = [0, 0], sizes = [8, 128], strides = [1, 1]} : vector<8x640xf32> to vector<8x128xf32>
    %30 = vector.broadcast %28 : vector<8x1xf32> to vector<8x128xf32>
    %31 = arith.mulf %30, %29 : vector<8x128xf32>
    %32 = vector.extract_strided_slice %18 {offsets = [0, 1], sizes = [8, 1], strides = [1, 1]} : vector<8x128xf32> to vector<8x1xf32>
    %33 = vector.extract_strided_slice %27 {offsets = [0, 128], sizes = [8, 128], strides = [1, 1]} : vector<8x640xf32> to vector<8x128xf32>
    %34 = vector.broadcast %32 : vector<8x1xf32> to vector<8x128xf32>
    %35 = arith.mulf %34, %33 : vector<8x128xf32>
    %36 = arith.addf %31, %35 : vector<8x128xf32>
    %37 = vector.extract_strided_slice %18 {offsets = [0, 2], sizes = [8, 1], strides = [1, 1]} : vector<8x128xf32> to vector<8x1xf32>
    %38 = vector.extract_strided_slice %27 {offsets = [0, 256], sizes = [8, 128], strides = [1, 1]} : vector<8x640xf32> to vector<8x128xf32>
    %39 = vector.broadcast %37 : vector<8x1xf32> to vector<8x128xf32>
    %40 = arith.mulf %39, %38 : vector<8x128xf32>
    %41 = arith.addf %36, %40 : vector<8x128xf32>
    %42 = vector.extract_strided_slice %18 {offsets = [0, 3], sizes = [8, 1], strides = [1, 1]} : vector<8x128xf32> to vector<8x1xf32>
    %43 = vector.extract_strided_slice %27 {offsets = [0, 384], sizes = [8, 128], strides = [1, 1]} : vector<8x640xf32> to vector<8x128xf32>
    %44 = vector.broadcast %42 : vector<8x1xf32> to vector<8x128xf32>
    %45 = arith.mulf %44, %43 : vector<8x128xf32>
    %46 = arith.addf %41, %45 : vector<8x128xf32>
    %47 = vector.extract_strided_slice %18 {offsets = [0, 4], sizes = [8, 1], strides = [1, 1]} : vector<8x128xf32> to vector<8x1xf32>
    %48 = vector.extract_strided_slice %27 {offsets = [0, 512], sizes = [8, 128], strides = [1, 1]} : vector<8x640xf32> to vector<8x128xf32>
    %49 = vector.broadcast %47 : vector<8x1xf32> to vector<8x128xf32>
    %50 = arith.mulf %49, %48 : vector<8x128xf32>
    %51 = arith.addf %46, %50 : vector<8x128xf32>
    %c0_16 = arith.constant 0 : index
    %c0_17 = arith.constant 0 : index
    %52 = vector.load %arg11[%c0_16, %c0_17] : memref<8x128xf32, #tpu.memory_space<vmem>>, vector<8x128xf32>
    tpu.vector_store %arg11[%c0_16, %c0_17], %51 {strides = array<i32>} : memref<8x128xf32, #tpu.memory_space<vmem>>, vector<8x128xf32>,
    %c0_18 = arith.constant 0 : index
    %c0_19 = arith.constant 0 : index
    %c0_20 = arith.constant 0 : index
    %53 = vector.load %arg5[%c0_18, %c0_19, %c0_20] : memref<7x256x256xbf16, #tpu.memory_space<vmem>>, vector<1x256x256xbf16>
    %54 = vector.shape_cast %53 : vector<1x256x256xbf16> to vector<256x256xbf16>
    %55 = arith.truncf %51 : vector<8x128xf32> to vector<8x128xbf16>
    %56 = vector.extract_strided_slice %54 {offsets = [0, 0], sizes = [128, 256], strides = [1, 1]} : vector<256x256xbf16> to vector<128x256xbf16>
    %cst_21 = arith.constant dense<0.000000e+00> : vector<8x256xf32>
    %57 = tpu.matmul %55, %56, %cst_21 {dimension_numbers = #tpu.dot_dimension_numbers<[1], [0], [0], [1], [0, 0, 1, 1], [], []>} : vector<8x128xbf16>, vector<128x256xbf16>, vector<8x256xf32> -> vector<8x256xf32>
    %c0_22 = arith.constant 0 : index
    %c0_23 = arith.constant 0 : index
    %58 = vector.load %arg6[%c0_22, %c0_23] : memref<7x256xf32, #tpu.memory_space<vmem>>, vector<1x256xf32>
    %59 = vector.broadcast %58 : vector<1x256xf32> to vector<8x256xf32>
    %60 = arith.addf %57, %59 : vector<8x256xf32>
    %cst_24 = arith.constant 0.000000e+00 : f32
    %61 = vector.broadcast %cst_24 : f32 to vector<8x256xf32>
    %62 = arith.maximumf %60, %61 : vector<8x256xf32>
    %63 = arith.truncf %62 : vector<8x256xf32> to vector<8x256xbf16>
    %c1 = arith.constant 1 : index
    %c0_25 = arith.constant 0 : index
    %c0_26 = arith.constant 0 : index
    %64 = vector.load %arg5[%c1, %c0_25, %c0_26] : memref<7x256x256xbf16, #tpu.memory_space<vmem>>, vector<1x256x256xbf16>
    %65 = vector.shape_cast %64 : vector<1x256x256xbf16> to vector<256x256xbf16>
    %cst_27 = arith.constant dense<0.000000e+00> : vector<8x256xf32>
    %66 = tpu.matmul %63, %65, %cst_27 {dimension_numbers = #tpu.dot_dimension_numbers<[1], [0], [0], [1], [0, 0, 1, 1], [], []>} : vector<8x256xbf16>, vector<256x256xbf16>, vector<8x256xf32> -> vector<8x256xf32>
    %c1_28 = arith.constant 1 : index
    %c0_29 = arith.constant 0 : index
    %67 = vector.load %arg6[%c1_28, %c0_29] : memref<7x256xf32, #tpu.memory_space<vmem>>, vector<1x256xf32>
    %68 = vector.broadcast %67 : vector<1x256xf32> to vector<8x256xf32>
    %69 = arith.addf %66, %68 : vector<8x256xf32>
    %cst_30 = arith.constant 0.000000e+00 : f32
    %70 = vector.broadcast %cst_30 : f32 to vector<8x256xf32>
    %71 = arith.maximumf %69, %70 : vector<8x256xf32>
    %72 = arith.truncf %71 : vector<8x256xf32> to vector<8x256xbf16>
    %c2 = arith.constant 2 : index
    %c0_31 = arith.constant 0 : index
    %c0_32 = arith.constant 0 : index
    %73 = vector.load %arg5[%c2, %c0_31, %c0_32] : memref<7x256x256xbf16, #tpu.memory_space<vmem>>, vector<1x256x256xbf16>
    %74 = vector.shape_cast %73 : vector<1x256x256xbf16> to vector<256x256xbf16>
    %cst_33 = arith.constant dense<0.000000e+00> : vector<8x256xf32>
    %75 = tpu.matmul %72, %74, %cst_33 {dimension_numbers = #tpu.dot_dimension_numbers<[1], [0], [0], [1], [0, 0, 1, 1], [], []>} : vector<8x256xbf16>, vector<256x256xbf16>, vector<8x256xf32> -> vector<8x256xf32>
    %c2_34 = arith.constant 2 : index
    %c0_35 = arith.constant 0 : index
    %76 = vector.load %arg6[%c2_34, %c0_35] : memref<7x256xf32, #tpu.memory_space<vmem>>, vector<1x256xf32>
    %77 = vector.broadcast %76 : vector<1x256xf32> to vector<8x256xf32>
    %78 = arith.addf %75, %77 : vector<8x256xf32>
    %cst_36 = arith.constant 0.000000e+00 : f32
    %79 = vector.broadcast %cst_36 : f32 to vector<8x256xf32>
    %80 = arith.maximumf %78, %79 : vector<8x256xf32>
    %81 = arith.truncf %80 : vector<8x256xf32> to vector<8x256xbf16>
    %c3 = arith.constant 3 : index
    %c0_37 = arith.constant 0 : index
    %c0_38 = arith.constant 0 : index
    %82 = vector.load %arg5[%c3, %c0_37, %c0_38] : memref<7x256x256xbf16, #tpu.memory_space<vmem>>, vector<1x256x256xbf16>
    %83 = vector.shape_cast %82 : vector<1x256x256xbf16> to vector<256x256xbf16>
    %cst_39 = arith.constant dense<0.000000e+00> : vector<8x256xf32>
    %84 = tpu.matmul %81, %83, %cst_39 {dimension_numbers = #tpu.dot_dimension_numbers<[1], [0], [0], [1], [0, 0, 1, 1], [], []>} : vector<8x256xbf16>, vector<256x256xbf16>, vector<8x256xf32> -> vector<8x256xf32>
    %c3_40 = arith.constant 3 : index
    %c0_41 = arith.constant 0 : index
    %85 = vector.load %arg6[%c3_40, %c0_41] : memref<7x256xf32, #tpu.memory_space<vmem>>, vector<1x256xf32>
    %86 = vector.broadcast %85 : vector<1x256xf32> to vector<8x256xf32>
    %87 = arith.addf %84, %86 : vector<8x256xf32>
    %cst_42 = arith.constant 0.000000e+00 : f32
    %88 = vector.broadcast %cst_42 : f32 to vector<8x256xf32>
    %89 = arith.maximumf %87, %88 : vector<8x256xf32>
    %90 = arith.truncf %89 : vector<8x256xf32> to vector<8x256xbf16>
    %c4 = arith.constant 4 : index
    %c0_43 = arith.constant 0 : index
    %c0_44 = arith.constant 0 : index
    %91 = vector.load %arg5[%c4, %c0_43, %c0_44] : memref<7x256x256xbf16, #tpu.memory_space<vmem>>, vector<1x256x256xbf16>
    %92 = vector.shape_cast %91 : vector<1x256x256xbf16> to vector<256x256xbf16>
    %cst_45 = arith.constant dense<0.000000e+00> : vector<8x256xf32>
    %93 = tpu.matmul %90, %92, %cst_45 {dimension_numbers = #tpu.dot_dimension_numbers<[1], [0], [0], [1], [0, 0, 1, 1], [], []>} : vector<8x256xbf16>, vector<256x256xbf16>, vector<8x256xf32> -> vector<8x256xf32>
    %c4_46 = arith.constant 4 : index
    %c0_47 = arith.constant 0 : index
    %94 = vector.load %arg6[%c4_46, %c0_47] : memref<7x256xf32, #tpu.memory_space<vmem>>, vector<1x256xf32>
    %95 = vector.broadcast %94 : vector<1x256xf32> to vector<8x256xf32>
    %96 = arith.addf %93, %95 : vector<8x256xf32>
    %cst_48 = arith.constant 0.000000e+00 : f32
    %97 = vector.broadcast %cst_48 : f32 to vector<8x256xf32>
    %98 = arith.maximumf %96, %97 : vector<8x256xf32>
    %99 = arith.truncf %98 : vector<8x256xf32> to vector<8x256xbf16>
    %c5 = arith.constant 5 : index
    %c0_49 = arith.constant 0 : index
    %c0_50 = arith.constant 0 : index
    %100 = vector.load %arg5[%c5, %c0_49, %c0_50] : memref<7x256x256xbf16, #tpu.memory_space<vmem>>, vector<1x256x256xbf16>
    %101 = vector.shape_cast %100 : vector<1x256x256xbf16> to vector<256x256xbf16>
    %cst_51 = arith.constant dense<0.000000e+00> : vector<8x256xf32>
    %102 = tpu.matmul %99, %101, %cst_51 {dimension_numbers = #tpu.dot_dimension_numbers<[1], [0], [0], [1], [0, 0, 1, 1], [], []>} : vector<8x256xbf16>, vector<256x256xbf16>, vector<8x256xf32> -> vector<8x256xf32>
    %c5_52 = arith.constant 5 : index
    %c0_53 = arith.constant 0 : index
    %103 = vector.load %arg6[%c5_52, %c0_53] : memref<7x256xf32, #tpu.memory_space<vmem>>, vector<1x256xf32>
    %104 = vector.broadcast %103 : vector<1x256xf32> to vector<8x256xf32>
    %105 = arith.addf %102, %104 : vector<8x256xf32>
    %cst_54 = arith.constant 0.000000e+00 : f32
    %106 = vector.broadcast %cst_54 : f32 to vector<8x256xf32>
    %107 = arith.maximumf %105, %106 : vector<8x256xf32>
    %108 = arith.truncf %107 : vector<8x256xf32> to vector<8x256xbf16>
    %c6 = arith.constant 6 : index
    %c0_55 = arith.constant 0 : index
    %c0_56 = arith.constant 0 : index
    %109 = vector.load %arg5[%c6, %c0_55, %c0_56] : memref<7x256x256xbf16, #tpu.memory_space<vmem>>, vector<1x256x256xbf16>
    %110 = vector.shape_cast %109 : vector<1x256x256xbf16> to vector<256x256xbf16>
    %cst_57 = arith.constant dense<0.000000e+00> : vector<8x256xf32>
    %111 = tpu.matmul %108, %110, %cst_57 {dimension_numbers = #tpu.dot_dimension_numbers<[1], [0], [0], [1], [0, 0, 1, 1], [], []>} : vector<8x256xbf16>, vector<256x256xbf16>, vector<8x256xf32> -> vector<8x256xf32>
    %c6_58 = arith.constant 6 : index
    %c0_59 = arith.constant 0 : index
    %112 = vector.load %arg6[%c6_58, %c0_59] : memref<7x256xf32, #tpu.memory_space<vmem>>, vector<1x256xf32>
    %113 = vector.broadcast %112 : vector<1x256xf32> to vector<8x256xf32>
    %114 = arith.addf %111, %113 : vector<8x256xf32>
    %115 = vector.extract_strided_slice %114 {offsets = [0, 0], sizes = [8, 128], strides = [1, 1]} : vector<8x256xf32> to vector<8x128xf32>
    %c0_60 = arith.constant 0 : index
    %c0_61 = arith.constant 0 : index
    %116 = vector.load %arg7[%c0_60, %c0_61] : memref<8x128xf32, #tpu.memory_space<vmem>>, vector<8x128xf32>
    tpu.vector_store %arg7[%c0_60, %c0_61], %115 {strides = array<i32>} : memref<8x128xf32, #tpu.memory_space<vmem>>, vector<8x128xf32>,
    return
  }
  func.func @transform_0(%arg0: i32) -> (i32, i32) {
    %c0_i32 = arith.constant 0 : i32
    %c0_i32_0 = arith.constant 0 : i32
    return %arg0, %c0_i32 : i32, i32
  }
  func.func @transform_1(%arg0: i32) -> (i32, i32) {
    %c0_i32 = arith.constant 0 : i32
    %c0_i32_0 = arith.constant 0 : i32
    return %arg0, %c0_i32 : i32, i32
  }
  func.func @transform_2(%arg0: i32) -> (i32, i32) {
    %c0_i32 = arith.constant 0 : i32
    %c0_i32_0 = arith.constant 0 : i32
    %c0_i32_1 = arith.constant 0 : i32
    return %c0_i32, %c0_i32_0 : i32, i32
  }
  func.func @transform_3(%arg0: i32) -> (i32, i32) {
    %c0_i32 = arith.constant 0 : i32
    %c0_i32_0 = arith.constant 0 : i32
    %c0_i32_1 = arith.constant 0 : i32
    return %c0_i32, %c0_i32_0 : i32, i32
  }
  func.func @transform_4(%arg0: i32) -> (i32, i32, i32) {
    %c0_i32 = arith.constant 0 : i32
    %c0_i32_0 = arith.constant 0 : i32
    %c0_i32_1 = arith.constant 0 : i32
    %c0_i32_2 = arith.constant 0 : i32
    return %c0_i32, %c0_i32_0, %c0_i32_1 : i32, i32, i32
  }
  func.func @transform_5(%arg0: i32) -> (i32, i32) {
    %c0_i32 = arith.constant 0 : i32
    %c0_i32_0 = arith.constant 0 : i32
    %c0_i32_1 = arith.constant 0 : i32
    return %c0_i32, %c0_i32_0 : i32, i32
  }
  func.func @transform_6(%arg0: i32) -> (i32, i32) {
    %c0_i32 = arith.constant 0 : i32
    %c0_i32_0 = arith.constant 0 : i32
    return %arg0, %c0_i32 : i32, i32
  }
  func.func @transform_7(%arg0: i32) -> (i32, i32) {
    %c0_i32 = arith.constant 0 : i32
    %c0_i32_0 = arith.constant 0 : i32
    return %arg0, %c0_i32 : i32, i32
  }
  func.func @transform_8(%arg0: i32) -> (i32, i32) {
    %c0_i32 = arith.constant 0 : i32
    %c0_i32_0 = arith.constant 0 : i32
    return %arg0, %c0_i32 : i32, i32
  }
  func.func @transform_9(%arg0: i32) -> (i32, i32) {
    %c0_i32 = arith.constant 0 : i32
    %c0_i32_0 = arith.constant 0 : i32
    return %arg0, %c0_i32 : i32, i32
  }
  func.func @transform_10(%arg0: i32) -> (i32, i32) {
    %c0_i32 = arith.constant 0 : i32
    %c0_i32_0 = arith.constant 0 : i32
    return %arg0, %c0_i32 : i32, i32
  }
}

</mosaic_0001>

<bundles_post_ra>
// kernel: vae_forward.1
= control target key start
LH: loop header
LB: loop body
LE: loop exit
PB: predicated region body
PF: predicated region fallthrough
CT: control target
= control target key end

     0   :  { %16 = vsyncpa [#allocation3], 0  ;;  %s4095_s0 = inlined_call_operand.hbm [shape: f32[8,128], index: 0, kind: input, shape index: {}]   ;;  %s4096_s1 = inlined_call_operand.hbm [shape: f32[8,640], index: 1, kind: input, shape index: {}]   ;;  %s4097_s2 = inlined_call_operand.hbm [shape: bf16[128,1408], index: 2, kind: input, shape index: {}]   ;;  %s4098_s3 = inlined_call_operand.hbm [shape: f32[1,1408], index: 3, kind: input, shape index: {}]   ;;  %s4099_s4 = inlined_call_operand.hbm [shape: bf16[7,256,256], index: 4, kind: input, shape index: {}]   ;;  %s4100_s5 = inlined_call_operand.vmem [shape: f32[7,256], index: 5, kind: input, shape index: {}]   ;;  %s4101_s6 = inlined_call_operand.hbm [shape: f32[8,128], index: 6, kind: output, shape index: {0}]   ;;  %s4102_s7 = inlined_call_operand.hbm [shape: f32[8,640], index: 7, kind: output, shape index: {1}]   ;;  %s4103_s8 = inlined_call_operand.hbm [shape: f32[8,640], index: 8, kind: output, shape index: {2}]   ;;  %s4104_s9 = inlined_call_operand.hbm [shape: f32[8,128], index: 9, kind: output, shape index: {3}]   ;;  %s4105_s10 = inlined_call_operand.hbm [shape: f32[8,128], index: 10, kind: output, shape index: {4}]  }
   0x1   :  { %17 = vsyncpa [#allocation6], 0 }
   0x2   :  { %18 = vsyncpa [#allocation9], 0 }
   0x3   :  { %19 = vsyncpa [#allocation4], 0 }
   0x4   :  { %20 = vsyncpa [#allocation13], 0 }
   0x5   :  { %21 = vsyncpa [#allocation16], 0  ;;  %s3791_s13 = smov [#allocation5]   ;;  %s3792_s15 = smov [#allocation8]  }
   0x6   :  { %s38_s14 = sshll.u32 %s3791_s13, 4  ;;  %s60_s16 = sshll.u32 %s3792_s15, 4  ;;  %s39_s14 = int_to_ptr.vmem [resolvable:$true] %s38_s14  ;;  %s61_s16 = int_to_ptr.vmem [resolvable:$true] %s60_s16 }
   0x7   :  { %s3559_s19 = scalar_lea.hbm %s4096_s1, 640 }
   0x8   :  { %p3560_p0 = scmp.ne.s32.totalorder %s4096_s1, %s3559_s19  ;;  %p3563_p1 = scmp.lt.u32.totalorder %s3559_s19, %s4096_s1 }
   0xa   :  { %p3565_p2 = pnand %p3563_p1, %p3560_p0 }
   0xc   :  { %3568 = shalt.err (!%p3565_p2)
}
   0xd   :  { %s3569_s24 = scalar_lea.vmem %s39_s14, 640  ;;  %p3574_p4 = scmp.lt.s32.totalorder %s39_s14, %s39_s14 }
   0xe   :  { %p3570_p3 = scmp.ne.s32.totalorder %s39_s14, %s3569_s24  ;;  %p3575_p5 = scmp.lt.s32.totalorder %s3569_s24, %s3569_s24 }
  0x10   :  { %p3576_p6 = por %p3575_p5, %p3574_p4 }
  0x12   :  { %p3577_p7 = pnand %p3576_p6, %p3570_p3 }
  0x14   :  { %3580 = shalt.err (!%p3577_p7)
}
  0x15   :  { %41 = dma.hbm_to_vmem [thread:$0]  %s4096_s1, 640, %s39_s14, [#allocation6]  }
  0x16   :  { %s3581_s29 = scalar_lea.hbm %s4098_s3, 176 }
  0x17   :  { %p3582_p8 = scmp.ne.s32.totalorder %s4098_s3, %s3581_s29  ;;  %p3585_p9 = scmp.lt.u32.totalorder %s3581_s29, %s4098_s3 }
  0x19   :  { %p3587_p10 = pnand %p3585_p9, %p3582_p8 }
  0x1b   :  { %3590 = shalt.err (!%p3587_p10)
}
  0x1c   :  { %s3591_s15 = scalar_lea.vmem %s61_s16, 176  ;;  %s3595_s17 = scalar_lea.vmem %s61_s16, 192 }
  0x1d   :  { %p3592_p11 = scmp.ne.s32.totalorder %s61_s16, %s3591_s15  ;;  %p3596_p12 = scmp.lt.s32.totalorder %s61_s16, %s61_s16 }
  0x1e   :  { %p3597_p13 = scmp.lt.s32.totalorder %s3595_s17, %s3591_s15 }
  0x20   :  { %p3598_p0 = por %p3597_p13, %p3596_p12 }
  0x22   :  { %p3599_p1 = pnand %p3598_p0, %p3592_p11 }
  0x24   :  { %3602 = shalt.err (!%p3599_p1)
}
  0x25   :  { %63 = dma.hbm_to_vmem [thread:$0]  %s4098_s3, 176, %s61_s16, [#allocation9]  }
  0x26   :  { %s3793_s18 = smov [#allocation2]   ;;  %s3794_s20 = smov [#allocation7]  }
  0x27   :  { %s28_s19 = sshll.u32 %s3793_s18, 4  ;;  %s47_s21 = sshll.u32 %s3794_s20, 4  ;;  %s29_s19 = int_to_ptr.vmem [resolvable:$true] %s28_s19  ;;  %s3891_s21 = int_to_ptr.vmem [resolvable:$true] %s47_s21 }
  0x28   :  { %s3603_s24 = scalar_lea.hbm %s4095_s0, 128 }
  0x29   :  { %p3604_p2 = scmp.ne.s32.totalorder %s4095_s0, %s3603_s24  ;;  %p3607_p3 = scmp.lt.u32.totalorder %s3603_s24, %s4095_s0 }
  0x2b   :  { %p3609_p4 = pnand %p3607_p3, %p3604_p2 }
  0x2d   :  { %3612 = shalt.err (!%p3609_p4)
}
  0x2e   :  { %s3613_s3 = scalar_lea.vmem %s29_s19, 128  ;;  %p3618_p6 = scmp.lt.s32.totalorder %s29_s19, %s29_s19 }
  0x2f   :  { %p3614_p5 = scmp.ne.s32.totalorder %s29_s19, %s3613_s3  ;;  %p3619_p7 = scmp.lt.s32.totalorder %s3613_s3, %s3613_s3 }
  0x31   :  { %p3620_p8 = por %p3619_p7, %p3618_p6 }
  0x33   :  { %p3621_p9 = pnand %p3620_p8, %p3614_p5 }
  0x35   :  { %3624 = shalt.err (!%p3621_p9)
}
  0x36   :  { %31 = dma.hbm_to_vmem [thread:$0]  %s4095_s0, 128, %s29_s19, [#allocation3]  }
  0x37   :  { %s3625_s12 = scalar_lea.hbm %s4097_s2, 11264 }
  0x38   :  { %p3626_p10 = scmp.ne.s32.totalorder %s4097_s2, %s3625_s12  ;;  %p3629_p11 = scmp.lt.u32.totalorder %s3625_s12, %s4097_s2 }
  0x3a   :  { %p3631_p12 = pnand %p3629_p11, %p3626_p10 }
  0x3c   :  { %3634 = shalt.err (!%p3631_p12)
}
  0x3d   :  { %s3635_s14 = scalar_lea.vmem %s3891_s21, 11264  ;;  %p3640_p0 = scmp.lt.s32.totalorder %s3891_s21, %s3891_s21 }
  0x3e   :  { %p3636_p13 = scmp.ne.s32.totalorder %s3891_s21, %s3635_s14  ;;  %p3641_p1 = scmp.lt.s32.totalorder %s3635_s14, %s3635_s14 }
  0x40   :  { %p3642_p2 = por %p3641_p1, %p3640_p0 }
  0x42   :  { %p3643_p3 = pnand %p3642_p2, %p3636_p13 }
  0x44   :  { %3646 = shalt.err (!%p3643_p3)
}
  0x45   :  { %s3795_s0 = smov 704   ;;  %s3796_s18 = smov 44  }
  0x46   :  { %53 = dma.hbm_to_vmem [thread:$0]  %s4097_s2, 11264, %s3891_s21, [#allocation6], %s3795_s0, %s3795_s0, %s3796_s18  }
  0x47   :  { %s3797_s22 = smov [#allocation10]   ;;  %s3647_s26 = scalar_lea.hbm %s4099_s4, 28672 }
  0x48   :  { %s69_s23 = sshll.u32 %s3797_s22, 4  ;;  %p3648_p4 = scmp.ne.s32.totalorder %s4099_s4, %s3647_s26  ;;  %s70_s23 = int_to_ptr.vmem [resolvable:$true] %s69_s23 }
  0x49   :  { %p3651_p5 = scmp.lt.u32.totalorder %s3647_s26, %s4099_s4 }
  0x4b   :  { %p3653_p6 = pnand %p3651_p5, %p3648_p4 }
  0x4d   :  { %3656 = shalt.err (!%p3653_p6)
}
  0x4e   :  { %s3657_s29 = scalar_lea.vmem %s70_s23, 28672  ;;  %p3662_p8 = scmp.lt.s32.totalorder %s70_s23, %s70_s23 }
  0x4f   :  { %p3658_p7 = scmp.ne.s32.totalorder %s70_s23, %s3657_s29  ;;  %p3663_p9 = scmp.lt.s32.totalorder %s3657_s29, %s3657_s29 }
  0x51   :  { %p3664_p10 = por %p3663_p9, %p3662_p8 }
  0x53   :  { %p3665_p11 = pnand %p3664_p10, %p3658_p7 }
  0x55   :  { %3668 = shalt.err (!%p3665_p11)
}
  0x56   :  { %s3798_s2 = smov 128   ;;  %s3799_s21 = smov 8  }
  0x57   :  { %75 = dma.hbm_to_vmem [thread:$0]  %s4099_s4, 28672, %s70_s23, [#allocation9], %s3798_s2, %s3798_s2, %s3799_s21  }
  0x58   :  { %3779 = dma.done.wait [#allocation3], 128  }
  0x59   :  { %3780 = vsyncadd [#allocation3], 4294967168 }
  0x5a   :  { %3781 = dma.done.wait [#allocation6], 11904  }
  0x5b   :  { %3782 = vsyncadd [#allocation6], 4294955392 }
  0x5c   :  { %3783 = dma.done.wait [#allocation9], 28848  }
  0x5d   :  { %3784 = vsyncadd [#allocation9], 4294938448  ;;  %v3800_v0 = vmov 0   ;;  %v3105_v1 = vld [vmem:[#allocation7 + $0x4] ss:$44 sps:$4 sm:$0xff]   ;;  %vm3802_vm0 = vmmov 0  }
  0x5e   :  { %772 = vmatprep.mubr.bf16.mxu1 %v3800_v0  ;;  %731 = vmatprep.mubr.bf16.mxu0 %v3800_v0  ;;  %v3107_v2 = vld [vmem:[#allocation7 + $0xc] ss:$44 sps:$4 sm:$0xff]   ;;  %v3110_v4 = vld [vmem:[#allocation7 + $0x8] ss:$44 sps:$4 sm:$0xff]   ;;  %v3113_v6 = vld [vmem:[#allocation7 + $0x64] ss:$44 sps:$4 sm:$0xff]  }
  0x5f   :  { %3099 = vset.pattern.permute.xlu1 %v3800_v0  ;;  %699 = vmatprep.subr.bf16.mxu0 %v3105_v1  ;;  %v3109_v3 = vld [vmem:[#allocation7] ss:$44 sps:$4 sm:$0xff]   ;;  %v3111_v5 = vld [vmem:[#allocation7 + $0x5c] ss:$44 sps:$4 sm:$0xff]   ;;  %v3115_v7 = vld [vmem:[#allocation7 + $0x58] ss:$44 sps:$4 sm:$0xff]  }
  0x60   :  { %740 = vmatprep.subr.bf16.mxu1 %v3107_v2  ;;  %700 = vmatpush1.bf16.msra.mxu0 %v3109_v3  ;;  %v3116_v8 = vld [vmem:[#allocation7 + $0x60] ss:$44 sps:$4 sm:$0xff]   ;;  %v3119_v10 = vld [vmem:[#allocation7 + $0xbc] ss:$44 sps:$4 sm:$0xff]   ;;  %v3122_v12 = vld [vmem:[#allocation7 + $0xb8] ss:$44 sps:$4 sm:$0xff]  }
  0x61   :  { %741 = vmatpush1.bf16.msra.mxu1 %v3110_v4  ;;  %701 = vmatprep.subr.bf16.mxu0 %v3111_v5  ;;  %v3117_v9 = vld [vmem:[#allocation7 + $0xb4] ss:$44 sps:$4 sm:$0xff]   ;;  %v3121_v11 = vld [vmem:[#allocation7 + $0xb0] ss:$44 sps:$4 sm:$0xff]   ;;  %v3123_v13 = vld [vmem:[#allocation7 + $0x10c] ss:$44 sps:$4 sm:$0xff]  }
  0x62   :  { %742 = vmatprep.subr.bf16.mxu1 %v3113_v6  ;;  %v3125_v14 = vld [vmem:[#allocation7 + $0x114] ss:$44 sps:$4 sm:$0xff]   ;;  %v3128_v16 = vld [vmem:[#allocation7 + $0x110] ss:$44 sps:$4 sm:$0xff]   ;;  %v3131_v18 = vld [vmem:[#allocation7 + $0x16c] ss:$44 sps:$4 sm:$0xff]  }
  0x63   :  { %v3127_v15 = vld [vmem:[#allocation7 + $0x108] ss:$44 sps:$4 sm:$0xff]   ;;  %v3129_v17 = vld [vmem:[#allocation7 + $0x164] ss:$44 sps:$4 sm:$0xff]   ;;  %v3133_v19 = vld [vmem:[#allocation7 + $0x160] ss:$44 sps:$4 sm:$0xff]  }
  0x64   :  { %702 = vmatpush1.bf16.msra.mxu0 %v3115_v7  ;;  %v3134_v20 = vld [vmem:[#allocation7 + $0x168] ss:$44 sps:$4 sm:$0xff]   ;;  %v3137_v22 = vld [vmem:[#allocation7 + $0x1c4] ss:$44 sps:$4 sm:$0xff]   ;;  %v3140_v24 = vld [vmem:[#allocation7 + $0x1c0] ss:$44 sps:$4 sm:$0xff]  }
  0x65   :  { %743 = vmatpush1.bf16.msra.mxu1 %v3116_v8  ;;  %703 = vmatprep.subr.bf16.mxu0 %v3117_v9  ;;  %v3135_v21 = vld [vmem:[#allocation7 + $0x1bc] ss:$44 sps:$4 sm:$0xff]   ;;  %v3139_v23 = vld [vmem:[#allocation7 + $0x1b8] ss:$44 sps:$4 sm:$0xff]   ;;  %v3141_v25 = vld [vmem:[#allocation7 + $0x214] ss:$44 sps:$4 sm:$0xff]  }
  0x66   :  { %744 = vmatprep.subr.bf16.mxu1 %v3119_v10  ;;  %v3143_v26 = vld [vmem:[#allocation7 + $0x21c] ss:$44 sps:$4 sm:$0xff]   ;;  %v3146_v28 = vld [vmem:[#allocation7 + $0x218] ss:$44 sps:$4 sm:$0xff]   ;;  %v3149_v30 = vld [vmem:[#allocation7 + $0x274] ss:$44 sps:$4 sm:$0xff]  }
  0x67   :  { %v3145_v27 = vld [vmem:[#allocation7 + $0x210] ss:$44 sps:$4 sm:$0xff]   ;;  %v3147_v29 = vld [vmem:[#allocation7 + $0x26c] ss:$44 sps:$4 sm:$0xff]   ;;  %v3151_v31 = vld [vmem:[#allocation7 + $0x268] ss:$44 sps:$4 sm:$0xff]  }
  0x68   :  { %704 = vmatpush1.bf16.msra.mxu0 %v3121_v11  ;;  %v3152_v32 = vld [vmem:[#allocation7 + $0x270] ss:$44 sps:$4 sm:$0xff]   ;;  %v3155_v34 = vld [vmem:[#allocation7 + $0x14] ss:$44 sps:$4 sm:$0xff]   ;;  %v3156_v38 = vld [vmem:[#allocation7 + $0x18] ss:$44 sps:$4 sm:$0xff]  }
  0x69   :  { %745 = vmatpush1.bf16.msra.mxu1 %v3122_v12  ;;  %705 = vmatprep.subr.bf16.mxu0 %v3123_v13  ;;  %v94_v33 = vld [vmem:[#allocation2] sm:$0xff]  ;;  %v3158_v35 = vld [vmem:[#allocation7 + $0x1c] ss:$44 sps:$4 sm:$0xff]   ;;  %v3161_v39 = vld [vmem:[#allocation7 + $0x6c] ss:$44 sps:$4 sm:$0xff]   ;;  %v3801_v8 = vmov 0.0  }
  0x6a   :  { %746 = vmatprep.subr.bf16.mxu1 %v3125_v14  ;;  %v3937_v36 = vpack.c.bf16 %v94_v33, %v94_v33  ;;  %v3153_v37 = vld [vmem:[#allocation7 + $0x10] ss:$44 sps:$4 sm:$0xff]   ;;  %v3164_v40 = vld [vmem:[#allocation7 + $0x74] ss:$44 sps:$4 sm:$0xff]   ;;  %v3170_v44 = vld [vmem:[#allocation7 + $0xcc] ss:$44 sps:$4 sm:$0xff]  }
  0x6b   :  { %v3159_v41 = vld [vmem:[#allocation7 + $0x68] ss:$44 sps:$4 sm:$0xff]   ;;  %v3162_v42 = vld [vmem:[#allocation7 + $0x70] ss:$44 sps:$4 sm:$0xff]   ;;  %v3165_v45 = vld [vmem:[#allocation7 + $0xc0] ss:$44 sps:$4 sm:$0xff]  }
  0x6c   :  { %706 = vmatpush1.bf16.msra.mxu0 %v3127_v15  ;;  %v3167_v43 = vld [vmem:[#allocation7 + $0xc4] ss:$44 sps:$4 sm:$0xff]   ;;  %v3168_v46 = vld [vmem:[#allocation7 + $0xc8] ss:$44 sps:$4 sm:$0xff]   ;;  %v3174_v50 = vld [vmem:[#allocation7 + $0x120] ss:$44 sps:$4 sm:$0xff]  }
  0x6d   :  { %747 = vmatpush1.bf16.msra.mxu1 %v3128_v16  ;;  %707 = vmatprep.subr.bf16.mxu0 %v3129_v17  ;;  %v3173_v47 = vld [vmem:[#allocation7 + $0x11c] ss:$44 sps:$4 sm:$0xff]   ;;  %v3176_v48 = vld [vmem:[#allocation7 + $0x124] ss:$44 sps:$4 sm:$0xff]   ;;  %v3179_v51 = vld [vmem:[#allocation7 + $0x174] ss:$44 sps:$4 sm:$0xff]  }
  0x6e   :  { %748 = vmatprep.subr.bf16.mxu1 %v3131_v18  ;;  %v3171_v49 = vld [vmem:[#allocation7 + $0x118] ss:$44 sps:$4 sm:$0xff]   ;;  %v3182_v52 = vld [vmem:[#allocation7 + $0x17c] ss:$44 sps:$4 sm:$0xff]   ;;  %v3188_v56 = vld [vmem:[#allocation7 + $0x1d4] ss:$44 sps:$4 sm:$0xff]  }
  0x6f   :  { %v3177_v53 = vld [vmem:[#allocation7 + $0x170] ss:$44 sps:$4 sm:$0xff]   ;;  %v3180_v54 = vld [vmem:[#allocation7 + $0x178] ss:$44 sps:$4 sm:$0xff]   ;;  %v3183_v57 = vld [vmem:[#allocation7 + $0x1c8] ss:$44 sps:$4 sm:$0xff]  }
  0x70   :  { %708 = vmatpush1.bf16.msra.mxu0 %v3133_v19  ;;  %v3185_v55 = vld [vmem:[#allocation7 + $0x1cc] ss:$44 sps:$4 sm:$0xff]   ;;  %v3186_v58 = vld [vmem:[#allocation7 + $0x1d0] ss:$44 sps:$4 sm:$0xff]   ;;  %v3192_v62 = vld [vmem:[#allocation7 + $0x228] ss:$44 sps:$4 sm:$0xff]  }
  0x71   :  { %749 = vmatpush1.bf16.msra.mxu1 %v3134_v20  ;;  %709 = vmatprep.subr.bf16.mxu0 %v3135_v21  ;;  %v3191_v59 = vld [vmem:[#allocation7 + $0x224] ss:$44 sps:$4 sm:$0xff]   ;;  %v3194_v60 = vld [vmem:[#allocation7 + $0x22c] ss:$44 sps:$4 sm:$0xff]   ;;  %v3197_v63 = vld [vmem:[#allocation7 + $0x27c] ss:$44 sps:$4 sm:$0xff]  }
  0x72   :  { %750 = vmatprep.subr.bf16.mxu1 %v3137_v22  ;;  %v3189_v61 = vld [vmem:[#allocation7 + $0x220] ss:$44 sps:$4 sm:$0xff]   ;;  %v3200_v1 = vld [vmem:[#allocation7 + $0x284] ss:$44 sps:$4 sm:$0xff]   ;;  %v3204_v6 = vld [vmem:[#allocation7 + $0x28] ss:$44 sps:$4 sm:$0xff]  }
  0x73   :  { %v3195_v2 = vld [vmem:[#allocation7 + $0x278] ss:$44 sps:$4 sm:$0xff]   ;;  %v3198_v3 = vld [vmem:[#allocation7 + $0x280] ss:$44 sps:$4 sm:$0xff]   ;;  %v3207_v7 = vld [vmem:[#allocation7 + $0x7c] ss:$44 sps:$4 sm:$0xff]  }
  0x74   :  { %710 = vmatpush1.bf16.msra.mxu0 %v3139_v23  ;;  %v3203_v4 = vld [vmem:[#allocation7 + $0x24] ss:$44 sps:$4 sm:$0xff]   ;;  %v3201_v5 = vld [vmem:[#allocation7 + $0x20] ss:$44 sps:$4 sm:$0xff]   ;;  %v3213_v15 = vld [vmem:[#allocation7 + $0x128] ss:$44 sps:$4 sm:$0xff]  }
  0x75   :  { %751 = vmatpush1.bf16.msra.mxu1 %v3140_v24  ;;  %711 = vmatprep.subr.bf16.mxu0 %v3141_v25  ;;  %v3205_v9 = vld [vmem:[#allocation7 + $0x78] ss:$44 sps:$4 sm:$0xff]   ;;  %v3208_v10 = vld [vmem:[#allocation7 + $0x80] ss:$44 sps:$4 sm:$0xff]   ;;  %v3209_v12 = vld [vmem:[#allocation7 + $0xd0] ss:$44 sps:$4 sm:$0xff]  }
  0x76   :  { %752 = vmatprep.subr.bf16.mxu1 %v3143_v26  ;;  %v3211_v11 = vld [vmem:[#allocation7 + $0xd4] ss:$44 sps:$4 sm:$0xff]   ;;  %v3212_v13 = vld [vmem:[#allocation7 + $0xd8] ss:$44 sps:$4 sm:$0xff]   ;;  %v3216_v16 = vld [vmem:[#allocation7 + $0x130] ss:$44 sps:$4 sm:$0xff]  }
  0x77   :  { %v3215_v14 = vld [vmem:[#allocation7 + $0x12c] ss:$44 sps:$4 sm:$0xff]   ;;  %v3219_v17 = vld [vmem:[#allocation7 + $0x184] ss:$44 sps:$4 sm:$0xff]   ;;  %v3220_v19 = vld [vmem:[#allocation7 + $0x188] ss:$44 sps:$4 sm:$0xff]  }
  0x78   :  { %712 = vmatpush1.bf16.msra.mxu0 %v3145_v27  ;;  %v3217_v18 = vld [vmem:[#allocation7 + $0x180] ss:$44 sps:$4 sm:$0xff]   ;;  %v3223_v20 = vld [vmem:[#allocation7 + $0x1dc] ss:$44 sps:$4 sm:$0xff]   ;;  %v3221_v21 = vld [vmem:[#allocation7 + $0x1d8] ss:$44 sps:$4 sm:$0xff]  }
  0x79   :  { %753 = vmatpush1.bf16.msra.mxu1 %v3146_v28  ;;  %713 = vmatprep.subr.bf16.mxu0 %v3147_v29  ;;  %v3224_v22 = vld [vmem:[#allocation7 + $0x1e0] ss:$44 sps:$4 sm:$0xff]   ;;  %v3225_v24 = vld [vmem:[#allocation7 + $0x230] ss:$44 sps:$4 sm:$0xff]   ;;  %v3228_v25 = vld [vmem:[#allocation7 + $0x238] ss:$44 sps:$4 sm:$0xff]   ;;  %v196_v29 = vlaneseq }
  0x7a   :  { %754 = vmatprep.subr.bf16.mxu1 %v3149_v30  ;;  %v3227_v23 = vld [vmem:[#allocation7 + $0x234] ss:$44 sps:$4 sm:$0xff]   ;;  %v3231_v26 = vld [vmem:[#allocation7 + $0x28c] ss:$44 sps:$4 sm:$0xff]   ;;  %v3232_v28 = vld [vmem:[#allocation7 + $0x290] ss:$44 sps:$4 sm:$0xff]  }
  0x7b   :  { %v3229_v27 = vld [vmem:[#allocation7 + $0x288] ss:$44 sps:$4 sm:$0xff]   ;;  %v3949_v30 = vshrl.u32 %v196_v29, 7  ;;  %s3807_s23 = smov [#allocation12]   ;;  %s3808_s25 = smov [#allocation15]  }
  0x7c   :  { %714 = vmatpush1.bf16.msra.mxu0 %v3151_v31  ;;  %s2692_s24 = sshll.u32 %s3807_s23, 4  ;;  %s2712_s26 = sshll.u32 %s3808_s25, 4  ;;  %s2693_s24 = int_to_ptr.vmem [resolvable:$true] %s2692_s24  ;;  %s2713_s26 = int_to_ptr.vmem [resolvable:$true] %s2712_s26 }
  0x7d   :  { %755 = vmatpush1.bf16.msra.mxu1 %v3152_v32  ;;  %781 = vmatprep.subr.bf16.mxu0 %v3155_v34  ;;  %v206_v31 = vsub.s32 2, %v3949_v30  ;;  %v192_v32 = vld [vmem:[#allocation8] sm:$0xff]  ;;  %v210_v33 = vsub.s32 3, %v3949_v30  ;;  %v3954_v34 = vsub.s32 1, %v3949_v30  ;;  %s3669_s27 = scalar_lea.vmem %s2693_s24, 640  ;;  %p3674_p13 = scmp.lt.s32.totalorder %s2693_s24, %s2693_s24 }
  0x7e   :  { %822 = vmatprep.subr.bf16.mxu1 %v3158_v35  ;;  %v3957_v35 = vsub.s32 0, %v3949_v30  ;;  %p3670_p12 = scmp.ne.s32.totalorder %s2693_s24, %s3669_s27  ;;  %p3675_p0 = scmp.lt.s32.totalorder %s3669_s27, %s3669_s27 }
  0x7f   :  { %732 = vmatmul.mubr.bf16.vlgmr.msra.gmra.mrb[0].mxu0 %v3937_v36 }
  0x80   :  { %773 = vmatmul.mubr.bf16.vlgmr.msra.gmra.mrb[0].mxu1 %v3937_v36  ;;  %782 = vmatpush1.bf16.msra.mxu0 %v3153_v37  ;;  %v207_v37 = vrot.slane %v192_v32, %v206_v31  ;;  %p3676_p1 = por %p3675_p0, %p3674_p13 }
  0x81   :  { %823 = vmatpush1.bf16.msra.mxu1 %v3156_v38  ;;  %783 = vmatprep.subr.bf16.mxu0 %v3161_v39  ;;  %v203_v38 = vrot.slane %v192_v32, %v3954_v34 }
  0x82   :  { %824 = vmatprep.subr.bf16.mxu1 %v3164_v40  ;;  %854 = vmatprep.mubr.bf16.mxu1 %v3800_v0  ;;  %p3677_p2 = pnand %p3676_p1, %p3670_p12 }
  0x83   :  { %813 = vmatprep.mubr.bf16.mxu0 %v3800_v0 }
  0x84   :  { %784 = vmatpush1.bf16.msra.mxu0 %v3159_v41 }
  0x85   :  { %825 = vmatpush1.bf16.msra.mxu1 %v3162_v42  ;;  %785 = vmatprep.subr.bf16.mxu0 %v3167_v43 }
  0x86   :  { %826 = vmatprep.subr.bf16.mxu1 %v3170_v44 }
  0x88   :  { %786 = vmatpush1.bf16.msra.mxu0 %v3165_v45 }
  0x89   :  { %827 = vmatpush1.bf16.msra.mxu1 %v3168_v46  ;;  %787 = vmatprep.subr.bf16.mxu0 %v3173_v47 }
  0x8a   :  { %828 = vmatprep.subr.bf16.mxu1 %v3176_v48 }
  0x8c   :  { %788 = vmatpush1.bf16.msra.mxu0 %v3171_v49 }
  0x8d   :  { %829 = vmatpush1.bf16.msra.mxu1 %v3174_v50  ;;  %789 = vmatprep.subr.bf16.mxu0 %v3179_v51  ;;  %v222_v51 = vsub.s32 6, %v3949_v30 }
  0x8e   :  { %830 = vmatprep.subr.bf16.mxu1 %v3182_v52  ;;  %v214_v52 = vsub.s32 4, %v3949_v30 }
  0x90   :  { %790 = vmatpush1.bf16.msra.mxu0 %v3177_v53  ;;  %v226_v53 = vsub.s32 7, %v3949_v30 }
  0x91   :  { %831 = vmatpush1.bf16.msra.mxu1 %v3180_v54  ;;  %791 = vmatprep.subr.bf16.mxu0 %v3185_v55  ;;  %v218_v54 = vsub.s32 5, %v3949_v30  ;;  %v223_v55 = vrot.slane %v192_v32, %v222_v51 }
  0x92   :  { %832 = vmatprep.subr.bf16.mxu1 %v3188_v56  ;;  %v215_v56 = vrot.slane %v192_v32, %v214_v52  ;;  %v3244_v52 = vld [vmem:[#allocation10 + $0x34] ss:$8 sps:$4 sm:$0xff]  }
  0x94   :  { %792 = vmatpush1.bf16.msra.mxu0 %v3183_v57  ;;  %v227_v57 = vrot.slane %v192_v32, %v226_v53  ;;  %v3242_v53 = vld [vmem:[#allocation10 + $0x30] ss:$8 sps:$4 sm:$0xff]  }
  0x95   :  { %833 = vmatpush1.bf16.msra.mxu1 %v3186_v58  ;;  %793 = vmatprep.subr.bf16.mxu0 %v3191_v59  ;;  %v219_v58 = vrot.slane %v192_v32, %v218_v54  ;;  %v3247_v54 = vld [vmem:[#allocation10 + $0x44] ss:$8 sps:$4 sm:$0xff]  }
  0x96   :  { %834 = vmatprep.subr.bf16.mxu1 %v3194_v60 }
  0x98   :  { %794 = vmatpush1.bf16.msra.mxu0 %v3189_v61 }
  0x99   :  { %835 = vmatpush1.bf16.msra.mxu1 %v3192_v62  ;;  %795 = vmatprep.subr.bf16.mxu0 %v3197_v63 }
  0x9a   :  { %836 = vmatprep.subr.bf16.mxu1 %v3200_v1 }
  0x9c   :  { %796 = vmatpush1.bf16.msra.mxu0 %v3195_v2 }
  0x9d   :  { %837 = vmatpush1.bf16.msra.mxu1 %v3198_v3  ;;  %863 = vmatprep.subr.bf16.mxu0 %v3203_v4 }
  0x9e   :  { %3058 = vmatprep.subr.bf16.mxu1 %v3801_v8 }
  0x9f   :  { %814 = vmatmul.mubr.bf16.vlgmr.msra.gmra.mrb[4].mxu0 %v3937_v36 }
  0xa0   :  { %855 = vmatmul.mubr.bf16.vlgmr.msra.gmra.mrb[4].mxu1 %v3937_v36  ;;  %864 = vmatpush1.bf16.msra.mxu0 %v3201_v5 }
  0xa1   :  { %3059 = vmatpush3.bf16.msra.mxu1 %v3204_v6  ;;  %865 = vmatprep.subr.bf16.mxu0 %v3207_v7 }
  0xa2   :  { %3060 = vmatprep.subr.bf16.mxu1 %v3801_v8  ;;  %895 = vmatprep.mubr.bf16.mxu0 %v3800_v0 }
  0xa3   :  { %3074 = vmatprep.mubr.msk.bf16.mxu1 %vm3802_vm0, %v3801_v8 }
  0xa4   :  { %866 = vmatpush1.bf16.msra.mxu0 %v3205_v9 }
  0xa5   :  { %3061 = vmatpush3.bf16.msra.mxu1 %v3208_v10  ;;  %867 = vmatprep.subr.bf16.mxu0 %v3211_v11 }
  0xa6   :  { %3062 = vmatprep.subr.bf16.mxu1 %v3801_v8 }
  0xa8   :  { %868 = vmatpush1.bf16.msra.mxu0 %v3209_v12  ;;  %v980_v12 = vld [vmem:[#allocation5 + $0x8] sm:$0xff] }
  0xa9   :  { %3063 = vmatpush3.bf16.msra.mxu1 %v3212_v13  ;;  %869 = vmatprep.subr.bf16.mxu0 %v3215_v14  ;;  %v981_v13 = vld [vmem:[#allocation5 + $0x10] sm:$0xff] }
  0xaa   :  { %3064 = vmatprep.subr.bf16.mxu1 %v3801_v8 }
  0xac   :  { %870 = vmatpush1.bf16.msra.mxu0 %v3213_v15 }
  0xad   :  { %3065 = vmatpush3.bf16.msra.mxu1 %v3216_v16  ;;  %871 = vmatprep.subr.bf16.mxu0 %v3219_v17 }
  0xae   :  { %3066 = vmatprep.subr.bf16.mxu1 %v3801_v8 }
  0xb0   :  { %872 = vmatpush1.bf16.msra.mxu0 %v3217_v18 }
  0xb1   :  { %3067 = vmatpush3.bf16.msra.mxu1 %v3220_v19  ;;  %873 = vmatprep.subr.bf16.mxu0 %v3223_v20  ;;  %v193_v20 = vld [vmem:[#allocation8 + $0x8] sm:$0x7] }
  0xb2   :  { %3068 = vmatprep.subr.bf16.mxu1 %v3801_v8  ;;  %v235_v30 = vrot.slane %v193_v20, %v3954_v34 }
  0xb4   :  { %874 = vmatpush1.bf16.msra.mxu0 %v3221_v21  ;;  %v231_v21 = vrot.slane %v193_v20, %v3957_v35 }
  0xb5   :  { %3069 = vmatpush3.bf16.msra.mxu1 %v3224_v22  ;;  %875 = vmatprep.subr.bf16.mxu0 %v3227_v23  ;;  %v239_v22 = vrot.slane %v193_v20, %v206_v31  ;;  %v3280_v20 = vld [vmem:[#allocation10 + $0x174] ss:$8 sps:$4 sm:$0xff]  }
  0xb6   :  { %3070 = vmatprep.subr.bf16.mxu1 %v3801_v8 }
  0xb8   :  { %876 = vmatpush1.bf16.msra.mxu0 %v3225_v24 }
  0xb9   :  { %3071 = vmatpush3.bf16.msra.mxu1 %v3228_v25  ;;  %877 = vmatprep.subr.bf16.mxu0 %v3231_v26 }
  0xba   :  { %3072 = vmatprep.subr.bf16.mxu1 %v3801_v8 }
  0xbc   :  { %878 = vmatpush1.bf16.msra.mxu0 %v3229_v27 }
  0xbd   :  { %3073 = vmatpush3.bf16.msra.mxu1 %v3232_v28 }
  0xbf   :  { %896 = vmatmul.mubr.bf16.vlgmr.msra.gmra.mrb[8].mxu0 %v3937_v36 }
  0xc0   :  { %3075 = vmatmul.mubr.bf16.vlgmr.msra.gmra.mrb[8].mxu1 %v3937_v36  ;;  %1166 = vmatprep.mubr.bf16.mxu0 %v3800_v0  ;;  %v199_v36 = vrot.slane %v192_v32, %v3957_v35  ;;  %v211_v0 = vrot.slane %v192_v32, %v210_v33 }
 0x152   :  { %v733_v40 = vpop.f32.mrb[0].mxu0 }
 0x153   :  { %v774_v39 = vpop.f32.mrb[0].mxu1  ;;  %v3963_v43 = vadd.f32 %v733_v40, %v199_v36  ;;  %v735_v44 = vpop.f32.mrb[1].mxu0 }
 0x154   :  { %v775_v41 = vadd.f32 %v774_v39, %v207_v37  ;;  %v776_v42 = vpop.f32.mrb[1].mxu1  ;;  %v736_v47 = vadd.f32 %v735_v44, %v203_v38  ;;  %v737_v48 = vpop.f32.mrb[2].mxu0  ;;  %v3233_v38 = vld [vmem:[#allocation10] ss:$8 sps:$4 sm:$0xff]   ;;  %v3235_v39 = vld [vmem:[#allocation10 + $0x4] ss:$8 sps:$4 sm:$0xff]  }
 0x155   :  { %v3965_v45 = vadd.f32 %v776_v42, %v211_v0  ;;  %v778_v46 = vpop.f32.mrb[2].mxu1  ;;  %953 = vst [vmem:[#allocation12] sm:$0xff] %v3963_v43  ;;  %v738_v50 = vpop.f32.mrb[3].mxu0  ;;  %v3803_v0 = vmov 2   ;;  %1134 = vmatprep.subr.bf16.mxu0 %v3235_v39  ;;  %v3239_v48 = vld [vmem:[#allocation10 + $0x20] ss:$8 sps:$4 sm:$0xff]  }
 0x156   :  { %955 = vst [vmem:[#allocation12 + $0x10] sm:$0xff] %v775_v41  ;;  %v779_v49 = vpop.f32.mrb[3].mxu1  ;;  %954 = vst [vmem:[#allocation12 + $0x8] sm:$0xff] %v736_v47  ;;  %3101 = vset.pattern.permute.xlu0 %v3803_v0  ;;  %1135 = vmatpush1.bf16.msra.mxu0 %v3233_v38  ;;  %v3236_v46 = vld [vmem:[#allocation10 + $0x10] ss:$8 sps:$4 sm:$0xff]  }
 0x157   :  { %956 = vst [vmem:[#allocation12 + $0x18] sm:$0xff] %v3965_v45  ;;  %v3296_v0 = vld [vmem:[#allocation10 + $0x1d0] ss:$8 sps:$4 sm:$0xff]  }
 0x172   :  { %v815_v60 = vpop.f32.mrb[4].mxu0 }
 0x173   :  { %v856_v59 = vpop.f32.mrb[4].mxu1  ;;  %v3973_v63 = vadd.f32 %v815_v60, %v215_v56  ;;  %v817_v1 = vpop.f32.mrb[5].mxu0  ;;  %v3245_v56 = vld [vmem:[#allocation10 + $0x40] ss:$8 sps:$4 sm:$0xff]   ;;  %v3806_v60 = vmov 3  }
 0x174   :  { %v857_v61 = vadd.f32 %v856_v59, %v223_v55  ;;  %v858_v62 = vpop.f32.mrb[5].mxu1  ;;  %v3975_v4 = vadd.f32 %v817_v1, %v219_v58  ;;  %v819_v5 = vpop.f32.mrb[6].mxu0  ;;  %v3804_v55 = vmov 1   ;;  %v3250_v58 = vld [vmem:[#allocation10 + $0x54] ss:$8 sps:$4 sm:$0xff]  }
 0x175   :  { %v859_v2 = vadd.f32 %v858_v62, %v227_v57  ;;  %v860_v3 = vpop.f32.mrb[6].mxu1  ;;  %957 = vst [vmem:[#allocation12 + $0x20] sm:$0xff] %v3973_v63  ;;  %v820_v8 = vpop.f32.mrb[7].mxu0  ;;  %v3805_v57 = vmov 4   ;;  %v3248_v59 = vld [vmem:[#allocation10 + $0x50] ss:$8 sps:$4 sm:$0xff]  }
 0x176   :  { %959 = vst [vmem:[#allocation14 + $0x8] sm:$0xff] %v857_v61  ;;  %v965_v6 = vmul.f32 0.5, %v857_v61  ;;  %v861_v7 = vpop.f32.mrb[7].mxu1  ;;  %958 = vst [vmem:[#allocation14] sm:$0xff] %v3975_v4  ;;  %v3253_v61 = vld [vmem:[#allocation10 + $0x64] ss:$8 sps:$4 sm:$0xff]  }
 0x177   :  { %960 = vst [vmem:[#allocation14 + $0x10] sm:$0xff] %v859_v2  ;;  %v966_v9 = vmul.f32 0.5, %v859_v2  ;;  %v3251_v62 = vld [vmem:[#allocation10 + $0x60] ss:$8 sps:$4 sm:$0xff]   ;;  %v3256_v1 = vld [vmem:[#allocation10 + $0x74] ss:$8 sps:$4 sm:$0xff]  }
 0x178   :  { %v971_v10 = vmul.f32 1.442695, %v965_v6  ;;  %v3254_v2 = vld [vmem:[#allocation10 + $0x70] ss:$8 sps:$4 sm:$0xff]   ;;  %v3257_v3 = vld [vmem:[#allocation10 + $0x100] ss:$8 sps:$4 sm:$0xff]  }
 0x179   :  { %v973_v11 = vmul.f32 1.442695, %v966_v9  ;;  %v3259_v5 = vld [vmem:[#allocation10 + $0x104] ss:$8 sps:$4 sm:$0xff]   ;;  %v3262_v6 = vld [vmem:[#allocation10 + $0x114] ss:$8 sps:$4 sm:$0xff]  }
 0x17a   :  { %3545 = vpow2.f32 %v971_v10  ;;  %1385 = vmatprep.subr.bf16.mxu1 %v3259_v5  ;;  %v3260_v7 = vld [vmem:[#allocation10 + $0x110] ss:$8 sps:$4 sm:$0xff]   ;;  %v3265_v8 = vld [vmem:[#allocation10 + $0x124] ss:$8 sps:$4 sm:$0xff]   ;;  %v3263_v9 = vld [vmem:[#allocation10 + $0x120] ss:$8 sps:$4 sm:$0xff]  }
 0x17b   :  { %3547 = vpow2.f32 %v973_v11  ;;  %1386 = vmatpush1.bf16.msra.mxu1 %v3257_v3  ;;  %v3268_v10 = vld [vmem:[#allocation10 + $0x134] ss:$8 sps:$4 sm:$0xff]   ;;  %v3266_v11 = vld [vmem:[#allocation10 + $0x130] ss:$8 sps:$4 sm:$0xff]  }
 0x17c   :  { %1387 = vmatprep.subr.bf16.mxu1 %v3262_v6 }
 0x17f   :  { %1388 = vmatpush1.bf16.msra.mxu1 %v3260_v7  ;;  %v3299_v7 = vld [vmem:[#allocation10 + $0x1e0] ss:$8 sps:$4 sm:$0xff]  }
 0x180   :  { %1389 = vmatprep.subr.bf16.mxu1 %v3265_v8  ;;  %v3302_v8 = vld [vmem:[#allocation10 + $0x1f0] ss:$8 sps:$4 sm:$0xff]  }
 0x183   :  { %1390 = vmatpush1.bf16.msra.mxu1 %v3263_v9  ;;  %v3307_v9 = vld [vmem:[#allocation10 + $0x204] ss:$8 sps:$4 sm:$0xff]  }
 0x184   :  { %v3546_v14 = vpop.eup %3545  ;;  %1391 = vmatprep.subr.bf16.mxu1 %v3268_v10  ;;  %v3310_v10 = vld [vmem:[#allocation10 + $0x214] ss:$8 sps:$4 sm:$0xff]  }
 0x185   :  { %v3548_v15 = vpop.eup %3547  ;;  %v985_v16 = vmul.f32 %v3546_v14, %v980_v12  ;;  %v3271_v12 = vld [vmem:[#allocation10 + $0x144] ss:$8 sps:$4 sm:$0xff]   ;;  %v3274_v14 = vld [vmem:[#allocation10 + $0x154] ss:$8 sps:$4 sm:$0xff]  }
 0x186   :  { %v986_v17 = vmul.f32 %v3548_v15, %v981_v13  ;;  %v3269_v13 = vld [vmem:[#allocation10 + $0x140] ss:$8 sps:$4 sm:$0xff]   ;;  %v3272_v15 = vld [vmem:[#allocation10 + $0x150] ss:$8 sps:$4 sm:$0xff]  }
 0x187   :  { %v3979_v18 = vadd.f32 %v985_v16, %v736_v47  ;;  %v3241_v47 = vld [vmem:[#allocation10 + $0x24] ss:$8 sps:$4 sm:$0xff]   ;;  %1392 = vmatpush1.bf16.msra.mxu1 %v3266_v11 }
 0x188   :  { %v3981_v19 = vadd.f32 %v986_v17, %v775_v41  ;;  %v3238_v41 = vld [vmem:[#allocation10 + $0x14] ss:$8 sps:$4 sm:$0xff]   ;;  %1393 = vmatprep.subr.bf16.mxu1 %v3271_v12  ;;  %v3277_v16 = vld [vmem:[#allocation10 + $0x164] ss:$8 sps:$4 sm:$0xff]   ;;  %v3275_v17 = vld [vmem:[#allocation10 + $0x160] ss:$8 sps:$4 sm:$0xff]  }
 0x189   :  { %1136 = vmatprep.subr.bf16.mxu0 %v3238_v41  ;;  %v3313_v11 = vld [vmem:[#allocation10 + $0x224] ss:$8 sps:$4 sm:$0xff]   ;;  %v3311_v12 = vld [vmem:[#allocation10 + $0x220] ss:$8 sps:$4 sm:$0xff]  }
 0x18a   :  { %1137 = vmatpush1.bf16.msra.mxu0 %v3236_v46  ;;  %v979_v46 = vld [vmem:[#allocation5] sm:$0xff] }
 0x18b   :  { %1138 = vmatprep.subr.bf16.mxu0 %v3241_v47  ;;  %1394 = vmatpush1.bf16.msra.mxu1 %v3269_v13  ;;  %v3316_v13 = vld [vmem:[#allocation10 + $0x234] ss:$8 sps:$4 sm:$0xff]  }
 0x18c   :  { %1395 = vmatprep.subr.bf16.mxu1 %v3274_v14  ;;  %v3314_v14 = vld [vmem:[#allocation10 + $0x230] ss:$8 sps:$4 sm:$0xff]  }
 0x18e   :  { %1139 = vmatpush1.bf16.msra.mxu0 %v3239_v48 }
 0x18f   :  { %1140 = vmatprep.subr.bf16.mxu0 %v3244_v52  ;;  %1396 = vmatpush1.bf16.msra.mxu1 %v3272_v15  ;;  %v3319_v15 = vld [vmem:[#allocation10 + $0x244] ss:$8 sps:$4 sm:$0xff]  }
 0x190   :  { %1397 = vmatprep.subr.bf16.mxu1 %v3277_v16  ;;  %v3317_v16 = vld [vmem:[#allocation10 + $0x240] ss:$8 sps:$4 sm:$0xff]  }
 0x192   :  { %v897_v23 = vpop.f32.mrb[8].mxu0  ;;  %1141 = vmatpush1.bf16.msra.mxu0 %v3242_v53 }
 0x193   :  { %v938_v24 = vpop.f32.mrb[8].mxu1  ;;  %v3986_v25 = vadd.f32 %v897_v23, %v231_v21  ;;  %v899_v31 = vpop.f32.mrb[9].mxu0  ;;  %1142 = vmatprep.subr.bf16.mxu0 %v3247_v54  ;;  %1398 = vmatpush1.bf16.msra.mxu1 %v3275_v17  ;;  %v3278_v21 = vld [vmem:[#allocation10 + $0x170] ss:$8 sps:$4 sm:$0xff]   ;;  %v3281_v23 = vld [vmem:[#allocation10 + $0x180] ss:$8 sps:$4 sm:$0xff]  }
 0x194   :  { %v939_v26 = vadd.f32 %v938_v24, %v239_v22  ;;  %v3076_v27 = vpop.f32.mrb[9].mxu1  ;;  %v901_v40 = vpop.f32.mrb[10].mxu0  ;;  %v3990_v42 = vadd.f32 %v899_v31, %v235_v30  ;;  %1399 = vmatprep.subr.bf16.mxu1 %v3280_v20  ;;  %v3283_v22 = vld [vmem:[#allocation10 + $0x184] ss:$8 sps:$4 sm:$0xff]   ;;  %v3286_v24 = vld [vmem:[#allocation10 + $0x194] ss:$8 sps:$4 sm:$0xff]  }
 0x195   :  { %v941_v28 = vpop.f32.mrb[10].mxu1  ;;  %961 = vst [vmem:[#allocation14 + $0x18] sm:$0xff] %v3986_v25  ;;  %v902_v44 = vpop.f32.mrb[11].mxu0  ;;  %v3289_v27 = vld [vmem:[#allocation10 + $0x1a4] ss:$8 sps:$4 sm:$0xff]   ;;  %v964_v30 = vmul.f32 0.5, %v3975_v4 }
 0x196   :  { %944 = vmax.xlane.f32.xlu0 %v939_v26  ;;  %v3077_v29 = vpop.f32.mrb[11].mxu1  ;;  %962 = vst [vmem:[#allocation14 + $0x20] sm:$0xff] %v3990_v42  ;;  %1143 = vmatpush1.bf16.msra.mxu0 %v3245_v56  ;;  %v3287_v28 = vld [vmem:[#allocation10 + $0x1a0] ss:$8 sps:$4 sm:$0xff]   ;;  %v967_v38 = vmul.f32 0.5, %v3986_v25  ;;  %v968_v40 = vmul.f32 0.5, %v3990_v42 }
 0x197   :  { %1144 = vmatprep.subr.bf16.mxu0 %v3250_v58  ;;  %1400 = vmatpush1.bf16.msra.mxu1 %v3278_v21  ;;  %v3292_v29 = vld [vmem:[#allocation10 + $0x1b4] ss:$8 sps:$4 sm:$0xff]   ;;  %v969_v31 = vmul.f32 1.442695, %v964_v30  ;;  %v983_v56 = vld [vmem:[#allocation5 + $0x20] sm:$0xff] }
 0x198   :  { %1401 = vmatprep.subr.bf16.mxu1 %v3283_v22  ;;  %v975_v39 = vmul.f32 1.442695, %v967_v38  ;;  %v977_v41 = vmul.f32 1.442695, %v968_v40  ;;  %v3322_v17 = vld [vmem:[#allocation10 + $0x254] ss:$8 sps:$4 sm:$0xff]  }
 0x199   :  { %v3320_v20 = vld [vmem:[#allocation10 + $0x250] ss:$8 sps:$4 sm:$0xff]   ;;  %v3325_v21 = vld [vmem:[#allocation10 + $0x264] ss:$8 sps:$4 sm:$0xff]   ;;  %v3323_v22 = vld [vmem:[#allocation10 + $0x260] ss:$8 sps:$4 sm:$0xff]  }
 0x19a   :  { %1145 = vmatpush1.bf16.msra.mxu0 %v3248_v59  ;;  %v3341_v30 = vld [vmem:[#allocation10 + $0x2c0] ss:$8 sps:$4 sm:$0xff]   ;;  %v3344_v38 = vld [vmem:[#allocation10 + $0x2d0] ss:$8 sps:$4 sm:$0xff]  }
 0x19b   :  { %1146 = vmatprep.subr.bf16.mxu0 %v3253_v61  ;;  %1402 = vmatpush1.bf16.msra.mxu1 %v3281_v23  ;;  %v3328_v23 = vld [vmem:[#allocation10 + $0x274] ss:$8 sps:$4 sm:$0xff]  }
 0x19c   :  { %1403 = vmatprep.subr.bf16.mxu1 %v3286_v24  ;;  %v3326_v24 = vld [vmem:[#allocation10 + $0x270] ss:$8 sps:$4 sm:$0xff]  }
 0x19e   :  { %1147 = vmatpush1.bf16.msra.mxu0 %v3251_v62 }
 0x19f   :  { %1148 = vmatprep.subr.bf16.mxu0 %v3256_v1 }
 0x1a2   :  { %1149 = vmatpush1.bf16.msra.mxu0 %v3254_v2 }
 0x1a3   :  { %1636 = vmatprep.subr.bf16.mxu0 %v3307_v9  ;;  %v3382_v9 = vld [vmem:[#allocation10 + $0x394] ss:$8 sps:$4 sm:$0xff]  }
 0x223   :  { %v945_v32 = vpop.xlane.xlu0 %944 }
 0x224   :  { %v946_v33 = vsub.f32 %v939_v26, %v945_v32  ;;  %v3284_v26 = vld [vmem:[#allocation10 + $0x190] ss:$8 sps:$4 sm:$0xff]  }
 0x225   :  { %1404 = vmatpush1.bf16.msra.mxu1 %v3284_v26  ;;  %v3290_v32 = vld [vmem:[#allocation10 + $0x1b0] ss:$8 sps:$4 sm:$0xff]   ;;  %v3331_v26 = vld [vmem:[#allocation10 + $0x284] ss:$8 sps:$4 sm:$0xff]  }
 0x226   :  { %v947_v37 = vmul.f32 1.442695, %v946_v33  ;;  %1405 = vmatprep.subr.bf16.mxu1 %v3289_v27  ;;  %v3295_v33 = vld [vmem:[#allocation10 + $0x1c4] ss:$8 sps:$4 sm:$0xff]   ;;  %v3329_v27 = vld [vmem:[#allocation10 + $0x280] ss:$8 sps:$4 sm:$0xff]  }
 0x228   :  { %3549 = vpow2.f32 %v947_v37  ;;  %v3293_v37 = vld [vmem:[#allocation10 + $0x1c0] ss:$8 sps:$4 sm:$0xff]  }
 0x229   :  { %1406 = vmatpush1.bf16.msra.mxu1 %v3287_v28  ;;  %v3334_v28 = vld [vmem:[#allocation10 + $0x294] ss:$8 sps:$4 sm:$0xff]  }
 0x22a   :  { %1407 = vmatprep.subr.bf16.mxu1 %v3292_v29  ;;  %v3332_v29 = vld [vmem:[#allocation10 + $0x290] ss:$8 sps:$4 sm:$0xff]  }
 0x22d   :  { %1408 = vmatpush1.bf16.msra.mxu1 %v3290_v32  ;;  %v3337_v32 = vld [vmem:[#allocation10 + $0x2a4] ss:$8 sps:$4 sm:$0xff]  }
 0x22e   :  { %1409 = vmatprep.subr.bf16.mxu1 %v3295_v33  ;;  %v3335_v33 = vld [vmem:[#allocation10 + $0x2a0] ss:$8 sps:$4 sm:$0xff]  }
 0x231   :  { %1410 = vmatpush1.bf16.msra.mxu1 %v3293_v37  ;;  %v3340_v37 = vld [vmem:[#allocation10 + $0x2b4] ss:$8 sps:$4 sm:$0xff]  }
 0x232   :  { %v3550_v36 = vpop.eup %3549 }
 0x233   :  { %949 = vadd.xlane.f32.xlu0 %v3550_v36 }
 0x2c0   :  { %v950_v49 = vpop.xlane.xlu0 %949 }
 0x2c1   :  { %3551 = vrcp.f32 %v950_v49 }
 0x2c2   :  { %3553 = vpow2.f32 %v969_v31  ;;  %v3346_v31 = vld [vmem:[#allocation10 + $0x2d4] ss:$8 sps:$4 sm:$0xff]  }
 0x2c3   :  { %3555 = vpow2.f32 %v975_v39  ;;  %v1042_v39 = vld [vmem:[%s4100_s5] ss:$8 sm:$0x3] }
 0x2c4   :  { %3557 = vpow2.f32 %v977_v41  ;;  %v1047_v40 = vrot.slane %v1042_v39, %v3957_v35  ;;  %v1051_v41 = vrot.slane %v1042_v39, %v3954_v34  ;;  %v3401_v39 = vld [vmem:[#allocation10 + $0x400] ss:$8 sps:$4 sm:$0xff]  }
 0x2cb   :  { %v3552_v50 = vpop.eup %3551 }
 0x2cc   :  { %v952_v51 = vmul.f32 %v3552_v50, %v3550_v36  ;;  %v3298_v36 = vld [vmem:[#allocation10 + $0x1d4] ss:$8 sps:$4 sm:$0xff]   ;;  %v3554_v44 = vpop.eup %3553  ;;  %v982_v50 = vld [vmem:[#allocation5 + $0x18] sm:$0xff] }
 0x2cd   :  { %1411 = vmatprep.subr.bf16.mxu1 %v3298_v36  ;;  %v984_v48 = vmul.f32 %v3554_v44, %v979_v46  ;;  %v3556_v49 = vpop.eup %3555  ;;  %v3338_v36 = vld [vmem:[#allocation10 + $0x2b0] ss:$8 sps:$4 sm:$0xff]  }
 0x2ce   :  { %963 = vst [vmem:[#allocation15] sm:$0xff] %v952_v51  ;;  %1007 = vperm.xlu0 %3101, %v952_v51   ;;  %996 = vperm.xlu1 %3099, %v952_v51   ;;  %v987_v53 = vmul.f32 %v3556_v49, %v982_v50 }
 0x2cf   :  { %1412 = vmatpush1.bf16.msra.mxu1 %v3296_v0  ;;  %v3343_v0 = vld [vmem:[#allocation10 + $0x2c4] ss:$8 sps:$4 sm:$0xff]  }
 0x2d0   :  { %v992_v58 = vadd.f32 %v987_v53, %v3965_v45  ;;  %v3305_v45 = vld [vmem:[#allocation10 + $0x200] ss:$8 sps:$4 sm:$0xff]  }
 0x2d2   :  { %3100 = vset.pattern.permute.xlu1 %v3804_v55  ;;  %3104 = vset.pattern.permute.xlu0 %v3805_v57  ;;  %v3558_v55 = vpop.eup %3557 }
 0x2d3   :  { %1001 = vperm.xlu1 %3100, %v952_v51   ;;  %v988_v61 = vmul.f32 %v3558_v55, %v983_v56  ;;  %v3352_v55 = vld [vmem:[#allocation10 + $0x2f4] ss:$8 sps:$4 sm:$0xff]   ;;  %v3350_v56 = vld [vmem:[#allocation10 + $0x2f0] ss:$8 sps:$4 sm:$0xff]  }
 0x2d7   :  { %3102 = vset.pattern.permute.xlu1 %v3806_v60 }
 0x2d8   :  { %1013 = vperm.xlu1 %3102, %v952_v51  }
 0x2dc   :  { %3103 = vset.pattern.permute.xlu1 %v3805_v57 }
 0x2dd   :  { %1019 = vperm.xlu1 %3103, %v952_v51   ;;  %v989_v51 = vadd.f32 %v984_v48, %v3963_v43  ;;  %v993_v43 = vadd.f32 %v988_v61, %v3973_v63  ;;  %v3308_v63 = vld [vmem:[#allocation10 + $0x210] ss:$8 sps:$4 sm:$0xff]   ;;  %v3359_v61 = vld [vmem:[#allocation10 + $0x320] ss:$8 sps:$4 sm:$0xff]  }
 0x34d   :  { %v997_v47 = vpop.permute.xlu1 %996  ;;  %v1008_v52 = vpop.permute.xlu0 %1007 }
 0x34e   :  { %v999_v54 = vmul.f32 %v997_v47, %v989_v51  ;;  %v1010_v42 = vmul.f32 %v1008_v52, %v3981_v19  ;;  %v3304_v19 = vld [vmem:[#allocation10 + $0x1f4] ss:$8 sps:$4 sm:$0xff]  }
 0x352   :  { %v1002_v4 = vpop.permute.xlu1 %1001 }
 0x353   :  { %v1004_v25 = vmul.f32 %v1002_v4, %v3979_v18  ;;  %v3301_v18 = vld [vmem:[#allocation10 + $0x1e4] ss:$8 sps:$4 sm:$0xff]  }
 0x354   :  { %1413 = vmatprep.subr.bf16.mxu1 %v3301_v18  ;;  %v3371_v18 = vld [vmem:[#allocation10 + $0x360] ss:$8 sps:$4 sm:$0xff]  }
 0x355   :  { %v1005_v57 = vadd.f32 %v1004_v25, %v999_v54  ;;  %1414 = vmatpush1.bf16.msra.mxu1 %v3299_v7  ;;  %v3349_v54 = vld [vmem:[#allocation10 + $0x2e4] ss:$8 sps:$4 sm:$0xff]   ;;  %v3347_v25 = vld [vmem:[#allocation10 + $0x2e0] ss:$8 sps:$4 sm:$0xff]   ;;  %v3376_v7 = vld [vmem:[#allocation10 + $0x374] ss:$8 sps:$4 sm:$0xff]  }
 0x356   :  { %1415 = vmatprep.subr.bf16.mxu1 %v3304_v19  ;;  %v3374_v19 = vld [vmem:[#allocation10 + $0x370] ss:$8 sps:$4 sm:$0xff]  }
 0x357   :  { %v1014_v59 = vpop.permute.xlu1 %1013  ;;  %v1011_v60 = vadd.f32 %v1010_v42, %v1005_v57  ;;  %v3353_v42 = vld [vmem:[#allocation10 + $0x300] ss:$8 sps:$4 sm:$0xff]   ;;  %v3355_v57 = vld [vmem:[#allocation10 + $0x304] ss:$8 sps:$4 sm:$0xff]  }
 0x358   :  { %v1016_v62 = vmul.f32 %v1014_v59, %v992_v58  ;;  %v3358_v58 = vld [vmem:[#allocation10 + $0x314] ss:$8 sps:$4 sm:$0xff]   ;;  %v3356_v59 = vld [vmem:[#allocation10 + $0x310] ss:$8 sps:$4 sm:$0xff]  }
 0x359   :  { %1416 = vmatpush1.bf16.msra.mxu1 %v3302_v8  ;;  %v3379_v8 = vld [vmem:[#allocation10 + $0x384] ss:$8 sps:$4 sm:$0xff]  }
 0x35a   :  { %v1017_v1 = vadd.f32 %v1016_v62, %v1011_v60  ;;  %1887 = vmatprep.subr.bf16.mxu1 %v3355_v57  ;;  %v3361_v60 = vld [vmem:[#allocation10 + $0x324] ss:$8 sps:$4 sm:$0xff]   ;;  %v3364_v62 = vld [vmem:[#allocation10 + $0x334] ss:$8 sps:$4 sm:$0xff]  }
 0x35b   :  { %v3430_v57 = vld [vmem:[#allocation10 + $0x494] ss:$8 sps:$4 sm:$0xff]  }
 0x35c   :  { %v1020_v2 = vpop.permute.xlu1 %1019 }
 0x35d   :  { %v1022_v3 = vmul.f32 %v1020_v2, %v993_v43  ;;  %v3367_v43 = vld [vmem:[#allocation10 + $0x344] ss:$8 sps:$4 sm:$0xff]   ;;  %v3365_v2 = vld [vmem:[#allocation10 + $0x340] ss:$8 sps:$4 sm:$0xff]  }
 0x35f   :  { %v1023_v5 = vadd.f32 %v1022_v3, %v1017_v1  ;;  %v3362_v1 = vld [vmem:[#allocation10 + $0x330] ss:$8 sps:$4 sm:$0xff]   ;;  %v3370_v3 = vld [vmem:[#allocation10 + $0x354] ss:$8 sps:$4 sm:$0xff]  }
 0x361   :  { %v1041_v6 = vpack.c.bf16 %v1023_v5, %v1023_v5  ;;  %1024 = vst [vmem:[#allocation17] sm:$0xff] %v1023_v5  ;;  %v3368_v5 = vld [vmem:[#allocation10 + $0x350] ss:$8 sps:$4 sm:$0xff]  }
 0x363   :  { %1167 = vmatmul.mubr.bf16.vlgmr.msra.gmra.mrb[12].mxu0 %v1041_v6  ;;  %v3373_v6 = vld [vmem:[#allocation10 + $0x364] ss:$8 sps:$4 sm:$0xff]  }
 0x364   :  { %1637 = vmatpush1.bf16.msra.mxu0 %v3305_v45  ;;  %v3377_v45 = vld [vmem:[#allocation10 + $0x380] ss:$8 sps:$4 sm:$0xff]  }
 0x365   :  { %1638 = vmatprep.subr.bf16.mxu0 %v3310_v10  ;;  %v3380_v10 = vld [vmem:[#allocation10 + $0x390] ss:$8 sps:$4 sm:$0xff]  }
 0x368   :  { %1639 = vmatpush1.bf16.msra.mxu0 %v3308_v63  ;;  %v3385_v63 = vld [vmem:[#allocation10 + $0x3a4] ss:$8 sps:$4 sm:$0xff]  }
 0x369   :  { %1640 = vmatprep.subr.bf16.mxu0 %v3313_v11  ;;  %v3383_v11 = vld [vmem:[#allocation10 + $0x3a0] ss:$8 sps:$4 sm:$0xff]  }
 0x36c   :  { %1641 = vmatpush1.bf16.msra.mxu0 %v3311_v12  ;;  %v3388_v12 = vld [vmem:[#allocation10 + $0x3b4] ss:$8 sps:$4 sm:$0xff]  }
 0x36d   :  { %1642 = vmatprep.subr.bf16.mxu0 %v3316_v13  ;;  %v3386_v13 = vld [vmem:[#allocation10 + $0x3b0] ss:$8 sps:$4 sm:$0xff]  }
 0x370   :  { %1643 = vmatpush1.bf16.msra.mxu0 %v3314_v14  ;;  %v3391_v14 = vld [vmem:[#allocation10 + $0x3c4] ss:$8 sps:$4 sm:$0xff]  }
 0x371   :  { %1644 = vmatprep.subr.bf16.mxu0 %v3319_v15  ;;  %v3389_v15 = vld [vmem:[#allocation10 + $0x3c0] ss:$8 sps:$4 sm:$0xff]  }
 0x374   :  { %1645 = vmatpush1.bf16.msra.mxu0 %v3317_v16  ;;  %v3394_v16 = vld [vmem:[#allocation10 + $0x3d4] ss:$8 sps:$4 sm:$0xff]  }
 0x375   :  { %1646 = vmatprep.subr.bf16.mxu0 %v3322_v17  ;;  %v3392_v17 = vld [vmem:[#allocation10 + $0x3d0] ss:$8 sps:$4 sm:$0xff]  }
 0x378   :  { %1647 = vmatpush1.bf16.msra.mxu0 %v3320_v20  ;;  %v2851_v20 = vld [vmem:[%s4100_s5 + $0x1] ss:$8 sm:$0x3] }
 0x379   :  { %1648 = vmatprep.subr.bf16.mxu0 %v3325_v21  ;;  %v1218_v21 = vrot.slane %v2851_v20, %v3957_v35 }
 0x37c   :  { %1649 = vmatpush1.bf16.msra.mxu0 %v3323_v22  ;;  %v1222_v22 = vrot.slane %v2851_v20, %v3954_v34  ;;  %v3449_v20 = vld [vmem:[#allocation10 + $0x500] ss:$8 sps:$4 sm:$0xff]  }
 0x37d   :  { %1650 = vmatprep.subr.bf16.mxu0 %v3328_v23 }
 0x380   :  { %1651 = vmatpush1.bf16.msra.mxu0 %v3326_v24 }
 0x381   :  { %1652 = vmatprep.subr.bf16.mxu0 %v3331_v26 }
 0x384   :  { %1653 = vmatpush1.bf16.msra.mxu0 %v3329_v27 }
 0x385   :  { %1654 = vmatprep.subr.bf16.mxu0 %v3334_v28 }
 0x388   :  { %1655 = vmatpush1.bf16.msra.mxu0 %v3332_v29 }
 0x389   :  { %1656 = vmatprep.subr.bf16.mxu0 %v3337_v32 }
 0x38c   :  { %1657 = vmatpush1.bf16.msra.mxu0 %v3335_v33 }
 0x38d   :  { %1658 = vmatprep.subr.bf16.mxu0 %v3340_v37 }
 0x390   :  { %1659 = vmatpush1.bf16.msra.mxu0 %v3338_v36 }
 0x391   :  { %1660 = vmatprep.subr.bf16.mxu0 %v3343_v0  ;;  %v3397_v0 = vld [vmem:[#allocation10 + $0x3e4] ss:$8 sps:$4 sm:$0xff]  }
 0x394   :  { %1661 = vmatpush1.bf16.msra.mxu0 %v3341_v30  ;;  %v3395_v30 = vld [vmem:[#allocation10 + $0x3e0] ss:$8 sps:$4 sm:$0xff]  }
 0x395   :  { %1662 = vmatprep.subr.bf16.mxu0 %v3346_v31  ;;  %v3400_v31 = vld [vmem:[#allocation10 + $0x3f4] ss:$8 sps:$4 sm:$0xff]  }
 0x398   :  { %1663 = vmatpush1.bf16.msra.mxu0 %v3344_v38  ;;  %v3398_v38 = vld [vmem:[#allocation10 + $0x3f0] ss:$8 sps:$4 sm:$0xff]  }
 0x399   :  { %1664 = vmatprep.subr.bf16.mxu0 %v3349_v54  ;;  %v3419_v54 = vld [vmem:[#allocation10 + $0x460] ss:$8 sps:$4 sm:$0xff]  }
 0x39c   :  { %1665 = vmatpush1.bf16.msra.mxu0 %v3347_v25  ;;  %v3424_v25 = vld [vmem:[#allocation10 + $0x474] ss:$8 sps:$4 sm:$0xff]  }
 0x39d   :  { %1666 = vmatprep.subr.bf16.mxu0 %v3352_v55  ;;  %v3422_v55 = vld [vmem:[#allocation10 + $0x470] ss:$8 sps:$4 sm:$0xff]  }
 0x3a0   :  { %1667 = vmatpush1.bf16.msra.mxu0 %v3350_v56  ;;  %v3427_v56 = vld [vmem:[#allocation10 + $0x484] ss:$8 sps:$4 sm:$0xff]  }
 0x436   :  { %v1168_v44 = vpop.f32.mrb[12].mxu0 }
 0x437   :  { %v1169_v46 = vadd.f32 %v1168_v44, %v1047_v40  ;;  %v1170_v47 = vpop.f32.mrb[13].mxu0  ;;  %v3403_v40 = vld [vmem:[#allocation10 + $0x404] ss:$8 sps:$4 sm:$0xff]   ;;  %v3404_v44 = vld [vmem:[#allocation10 + $0x410] ss:$8 sps:$4 sm:$0xff]  }
 0x438   :  { %v1171_v48 = vadd.f32 %v1170_v47, %v1051_v41  ;;  %v1172_v49 = vpop.f32.mrb[14].mxu0  ;;  %v3406_v41 = vld [vmem:[#allocation10 + $0x414] ss:$8 sps:$4 sm:$0xff]   ;;  %2138 = vmatprep.subr.bf16.mxu0 %v3403_v40  ;;  %v3407_v47 = vld [vmem:[#allocation10 + $0x420] ss:$8 sps:$4 sm:$0xff]  }
 0x439   :  { %v1175_v50 = vmax.f32 %v1169_v46, 0.0  ;;  %v1173_v51 = vpop.f32.mrb[15].mxu0  ;;  %v3409_v46 = vld [vmem:[#allocation10 + $0x424] ss:$8 sps:$4 sm:$0xff]   ;;  %v3410_v49 = vld [vmem:[#allocation10 + $0x430] ss:$8 sps:$4 sm:$0xff]  }
 0x43a   :  { %v1176_v52 = vmax.f32 %v1171_v48, 0.0  ;;  %v3412_v48 = vld [vmem:[#allocation10 + $0x434] ss:$8 sps:$4 sm:$0xff]   ;;  %v3413_v51 = vld [vmem:[#allocation10 + $0x440] ss:$8 sps:$4 sm:$0xff]  }
 0x43b   :  { %v1177_v53 = vpack.c.bf16 %v1175_v50, %v1175_v50  ;;  %v3415_v50 = vld [vmem:[#allocation10 + $0x444] ss:$8 sps:$4 sm:$0xff]   ;;  %v3478_v40 = vld [vmem:[#allocation10 + $0x594] ss:$8 sps:$4 sm:$0xff]  }
 0x43c   :  { %v1178_v4 = vpack.c.bf16 %v1176_v52, %v1176_v52  ;;  %v3418_v52 = vld [vmem:[#allocation10 + $0x454] ss:$8 sps:$4 sm:$0xff]  }
 0x43e   :  { %1417 = vmatprep.mubr.bf16.mxu1 %v1178_v4  ;;  %v3416_v4 = vld [vmem:[#allocation10 + $0x450] ss:$8 sps:$4 sm:$0xff]  }
 0x43f   :  { %1418 = vmatmul.mubr.bf16.vlgmr.msra.gmra.mrb[12].mxu1 %v1177_v53  ;;  %v3421_v53 = vld [vmem:[#allocation10 + $0x464] ss:$8 sps:$4 sm:$0xff]  }
 0x440   :  { %1888 = vmatpush1.bf16.msra.mxu1 %v3353_v42  ;;  %v3425_v42 = vld [vmem:[#allocation10 + $0x480] ss:$8 sps:$4 sm:$0xff]  }
 0x441   :  { %1889 = vmatprep.subr.bf16.mxu1 %v3358_v58  ;;  %v3428_v58 = vld [vmem:[#allocation10 + $0x490] ss:$8 sps:$4 sm:$0xff]  }
 0x444   :  { %1890 = vmatpush1.bf16.msra.mxu1 %v3356_v59  ;;  %v3433_v59 = vld [vmem:[#allocation10 + $0x4a4] ss:$8 sps:$4 sm:$0xff]  }
 0x445   :  { %1891 = vmatprep.subr.bf16.mxu1 %v3361_v60  ;;  %v3431_v60 = vld [vmem:[#allocation10 + $0x4a0] ss:$8 sps:$4 sm:$0xff]  }
 0x448   :  { %1892 = vmatpush1.bf16.msra.mxu1 %v3359_v61  ;;  %v3436_v61 = vld [vmem:[#allocation10 + $0x4b4] ss:$8 sps:$4 sm:$0xff]  }
 0x449   :  { %1893 = vmatprep.subr.bf16.mxu1 %v3364_v62  ;;  %v3434_v62 = vld [vmem:[#allocation10 + $0x4b0] ss:$8 sps:$4 sm:$0xff]  }
 0x44c   :  { %1894 = vmatpush1.bf16.msra.mxu1 %v3362_v1  ;;  %v3439_v1 = vld [vmem:[#allocation10 + $0x4c4] ss:$8 sps:$4 sm:$0xff]  }
 0x44d   :  { %1895 = vmatprep.subr.bf16.mxu1 %v3367_v43  ;;  %v3437_v43 = vld [vmem:[#allocation10 + $0x4c0] ss:$8 sps:$4 sm:$0xff]  }
 0x450   :  { %1896 = vmatpush1.bf16.msra.mxu1 %v3365_v2  ;;  %v3442_v2 = vld [vmem:[#allocation10 + $0x4d4] ss:$8 sps:$4 sm:$0xff]  }
 0x451   :  { %1897 = vmatprep.subr.bf16.mxu1 %v3370_v3  ;;  %v3440_v3 = vld [vmem:[#allocation10 + $0x4d0] ss:$8 sps:$4 sm:$0xff]  }
 0x454   :  { %1898 = vmatpush1.bf16.msra.mxu1 %v3368_v5  ;;  %v2884_v5 = vld [vmem:[%s4100_s5 + $0x2] ss:$8 sm:$0x3] }
 0x455   :  { %1899 = vmatprep.subr.bf16.mxu1 %v3373_v6  ;;  %v1469_v6 = vrot.slane %v2884_v5, %v3957_v35 }
 0x458   :  { %1900 = vmatpush1.bf16.msra.mxu1 %v3371_v18  ;;  %v1473_v18 = vrot.slane %v2884_v5, %v3954_v34  ;;  %v3497_v5 = vld [vmem:[#allocation10 + $0x600] ss:$8 sps:$4 sm:$0xff]  }
 0x459   :  { %1901 = vmatprep.subr.bf16.mxu1 %v3376_v7 }
 0x45c   :  { %1902 = vmatpush1.bf16.msra.mxu1 %v3374_v19 }
 0x45d   :  { %1903 = vmatprep.subr.bf16.mxu1 %v3379_v8 }
 0x460   :  { %1904 = vmatpush1.bf16.msra.mxu1 %v3377_v45 }
 0x461   :  { %1905 = vmatprep.subr.bf16.mxu1 %v3382_v9 }
 0x464   :  { %1906 = vmatpush1.bf16.msra.mxu1 %v3380_v10 }
 0x465   :  { %1907 = vmatprep.subr.bf16.mxu1 %v3385_v63 }
 0x468   :  { %1908 = vmatpush1.bf16.msra.mxu1 %v3383_v11 }
 0x469   :  { %1909 = vmatprep.subr.bf16.mxu1 %v3388_v12 }
 0x46c   :  { %1910 = vmatpush1.bf16.msra.mxu1 %v3386_v13 }
 0x46d   :  { %1911 = vmatprep.subr.bf16.mxu1 %v3391_v14  ;;  %v3445_v14 = vld [vmem:[#allocation10 + $0x4e4] ss:$8 sps:$4 sm:$0xff]  }
 0x470   :  { %1912 = vmatpush1.bf16.msra.mxu1 %v3389_v15  ;;  %v3443_v15 = vld [vmem:[#allocation10 + $0x4e0] ss:$8 sps:$4 sm:$0xff]  }
 0x471   :  { %1913 = vmatprep.subr.bf16.mxu1 %v3394_v16  ;;  %v3448_v16 = vld [vmem:[#allocation10 + $0x4f4] ss:$8 sps:$4 sm:$0xff]  }
 0x474   :  { %1914 = vmatpush1.bf16.msra.mxu1 %v3392_v17  ;;  %v3446_v17 = vld [vmem:[#allocation10 + $0x4f0] ss:$8 sps:$4 sm:$0xff]  }
 0x475   :  { %1915 = vmatprep.subr.bf16.mxu1 %v3397_v0  ;;  %v3467_v0 = vld [vmem:[#allocation10 + $0x560] ss:$8 sps:$4 sm:$0xff]  }
 0x478   :  { %1916 = vmatpush1.bf16.msra.mxu1 %v3395_v30  ;;  %v3472_v30 = vld [vmem:[#allocation10 + $0x574] ss:$8 sps:$4 sm:$0xff]  }
 0x479   :  { %1917 = vmatprep.subr.bf16.mxu1 %v3400_v31  ;;  %v3470_v31 = vld [vmem:[#allocation10 + $0x570] ss:$8 sps:$4 sm:$0xff]  }
 0x47c   :  { %1918 = vmatpush1.bf16.msra.mxu1 %v3398_v38  ;;  %v3475_v38 = vld [vmem:[#allocation10 + $0x584] ss:$8 sps:$4 sm:$0xff]  }
 0x512   :  { %v1419_v23 = vpop.f32.mrb[12].mxu1 }
 0x513   :  { %v1420_v24 = vadd.f32 %v1419_v23, %v1218_v21  ;;  %v1421_v26 = vpop.f32.mrb[13].mxu1  ;;  %v3451_v21 = vld [vmem:[#allocation10 + $0x504] ss:$8 sps:$4 sm:$0xff]   ;;  %v3452_v23 = vld [vmem:[#allocation10 + $0x510] ss:$8 sps:$4 sm:$0xff]  }
 0x514   :  { %v1422_v27 = vadd.f32 %v1421_v26, %v1222_v22  ;;  %v1423_v28 = vpop.f32.mrb[14].mxu1  ;;  %v3454_v22 = vld [vmem:[#allocation10 + $0x514] ss:$8 sps:$4 sm:$0xff]   ;;  %2389 = vmatprep.subr.bf16.mxu1 %v3451_v21  ;;  %v3455_v26 = vld [vmem:[#allocation10 + $0x520] ss:$8 sps:$4 sm:$0xff]  }
 0x515   :  { %v1426_v29 = vmax.f32 %v1420_v24, 0.0  ;;  %v1424_v32 = vpop.f32.mrb[15].mxu1  ;;  %v3457_v24 = vld [vmem:[#allocation10 + $0x524] ss:$8 sps:$4 sm:$0xff]   ;;  %v3458_v28 = vld [vmem:[#allocation10 + $0x530] ss:$8 sps:$4 sm:$0xff]  }
 0x516   :  { %v1427_v33 = vmax.f32 %v1422_v27, 0.0  ;;  %v3460_v27 = vld [vmem:[#allocation10 + $0x534] ss:$8 sps:$4 sm:$0xff]   ;;  %v3461_v32 = vld [vmem:[#allocation10 + $0x540] ss:$8 sps:$4 sm:$0xff]  }
 0x517   :  { %v1428_v36 = vpack.c.bf16 %v1426_v29, %v1426_v29  ;;  %v3463_v29 = vld [vmem:[#allocation10 + $0x544] ss:$8 sps:$4 sm:$0xff]   ;;  %v3526_v21 = vld [vmem:[#allocation10 + $0x694] ss:$8 sps:$4 sm:$0xff]  }
 0x518   :  { %v1429_v37 = vpack.c.bf16 %v1427_v33, %v1427_v33  ;;  %v3466_v33 = vld [vmem:[#allocation10 + $0x554] ss:$8 sps:$4 sm:$0xff]  }
 0x51a   :  { %1668 = vmatprep.mubr.bf16.mxu0 %v1429_v37  ;;  %v3464_v37 = vld [vmem:[#allocation10 + $0x550] ss:$8 sps:$4 sm:$0xff]  }
 0x51b   :  { %1669 = vmatmul.mubr.bf16.vlgmr.msra.gmra.mrb[16].mxu0 %v1428_v36  ;;  %v3469_v36 = vld [vmem:[#allocation10 + $0x564] ss:$8 sps:$4 sm:$0xff]  }
 0x51c   :  { %2139 = vmatpush1.bf16.msra.mxu0 %v3401_v39  ;;  %v3473_v39 = vld [vmem:[#allocation10 + $0x580] ss:$8 sps:$4 sm:$0xff]  }
 0x51d   :  { %2140 = vmatprep.subr.bf16.mxu0 %v3406_v41  ;;  %v3476_v41 = vld [vmem:[#allocation10 + $0x590] ss:$8 sps:$4 sm:$0xff]  }
 0x520   :  { %2141 = vmatpush1.bf16.msra.mxu0 %v3404_v44  ;;  %v3481_v44 = vld [vmem:[#allocation10 + $0x5a4] ss:$8 sps:$4 sm:$0xff]  }
 0x521   :  { %2142 = vmatprep.subr.bf16.mxu0 %v3409_v46  ;;  %v3479_v46 = vld [vmem:[#allocation10 + $0x5a0] ss:$8 sps:$4 sm:$0xff]  }
 0x524   :  { %2143 = vmatpush1.bf16.msra.mxu0 %v3407_v47  ;;  %v3484_v47 = vld [vmem:[#allocation10 + $0x5b4] ss:$8 sps:$4 sm:$0xff]  }
 0x525   :  { %2144 = vmatprep.subr.bf16.mxu0 %v3412_v48  ;;  %v3482_v48 = vld [vmem:[#allocation10 + $0x5b0] ss:$8 sps:$4 sm:$0xff]  }
 0x528   :  { %2145 = vmatpush1.bf16.msra.mxu0 %v3410_v49  ;;  %v3487_v49 = vld [vmem:[#allocation10 + $0x5c4] ss:$8 sps:$4 sm:$0xff]  }
 0x529   :  { %2146 = vmatprep.subr.bf16.mxu0 %v3415_v50  ;;  %v3485_v50 = vld [vmem:[#allocation10 + $0x5c0] ss:$8 sps:$4 sm:$0xff]  }
 0x52c   :  { %2147 = vmatpush1.bf16.msra.mxu0 %v3413_v51  ;;  %v3490_v51 = vld [vmem:[#allocation10 + $0x5d4] ss:$8 sps:$4 sm:$0xff]  }
 0x52d   :  { %2148 = vmatprep.subr.bf16.mxu0 %v3418_v52  ;;  %v3488_v52 = vld [vmem:[#allocation10 + $0x5d0] ss:$8 sps:$4 sm:$0xff]  }
 0x530   :  { %2149 = vmatpush1.bf16.msra.mxu0 %v3416_v4  ;;  %v2917_v4 = vld [vmem:[%s4100_s5 + $0x3] ss:$8 sm:$0x3] }
 0x531   :  { %2150 = vmatprep.subr.bf16.mxu0 %v3421_v53  ;;  %v1720_v53 = vrot.slane %v2917_v4, %v3957_v35 }
 0x534   :  { %2151 = vmatpush1.bf16.msra.mxu0 %v3419_v54  ;;  %v1724_v54 = vrot.slane %v2917_v4, %v3954_v34  ;;  %v2983_v4 = vld [vmem:[%s4100_s5 + $0x5] ss:$8 sm:$0x3] }
 0x535   :  { %2152 = vmatprep.subr.bf16.mxu0 %v3424_v25 }
 0x538   :  { %2153 = vmatpush1.bf16.msra.mxu0 %v3422_v55 }
 0x539   :  { %2154 = vmatprep.subr.bf16.mxu0 %v3427_v56 }
 0x53c   :  { %2155 = vmatpush1.bf16.msra.mxu0 %v3425_v42 }
 0x53d   :  { %2156 = vmatprep.subr.bf16.mxu0 %v3430_v57 }
 0x540   :  { %2157 = vmatpush1.bf16.msra.mxu0 %v3428_v58 }
 0x541   :  { %2158 = vmatprep.subr.bf16.mxu0 %v3433_v59 }
 0x544   :  { %2159 = vmatpush1.bf16.msra.mxu0 %v3431_v60 }
 0x545   :  { %2160 = vmatprep.subr.bf16.mxu0 %v3436_v61 }
 0x548   :  { %2161 = vmatpush1.bf16.msra.mxu0 %v3434_v62 }
 0x549   :  { %2162 = vmatprep.subr.bf16.mxu0 %v3439_v1  ;;  %v3493_v1 = vld [vmem:[#allocation10 + $0x5e4] ss:$8 sps:$4 sm:$0xff]  }
 0x54c   :  { %2163 = vmatpush1.bf16.msra.mxu0 %v3437_v43  ;;  %v3491_v43 = vld [vmem:[#allocation10 + $0x5e0] ss:$8 sps:$4 sm:$0xff]  }
 0x54d   :  { %2164 = vmatprep.subr.bf16.mxu0 %v3442_v2  ;;  %v3496_v2 = vld [vmem:[#allocation10 + $0x5f4] ss:$8 sps:$4 sm:$0xff]  }
 0x550   :  { %2165 = vmatpush1.bf16.msra.mxu0 %v3440_v3  ;;  %v3494_v3 = vld [vmem:[#allocation10 + $0x5f0] ss:$8 sps:$4 sm:$0xff]  }
 0x551   :  { %2166 = vmatprep.subr.bf16.mxu0 %v3445_v14  ;;  %v3515_v14 = vld [vmem:[#allocation10 + $0x660] ss:$8 sps:$4 sm:$0xff]  }
 0x554   :  { %2167 = vmatpush1.bf16.msra.mxu0 %v3443_v15  ;;  %v3520_v15 = vld [vmem:[#allocation10 + $0x674] ss:$8 sps:$4 sm:$0xff]  }
 0x555   :  { %2168 = vmatprep.subr.bf16.mxu0 %v3448_v16  ;;  %v3518_v16 = vld [vmem:[#allocation10 + $0x670] ss:$8 sps:$4 sm:$0xff]  }
 0x558   :  { %2169 = vmatpush1.bf16.msra.mxu0 %v3446_v17  ;;  %v3523_v17 = vld [vmem:[#allocation10 + $0x684] ss:$8 sps:$4 sm:$0xff]  }
 0x5ee   :  { %v1670_v7 = vpop.f32.mrb[16].mxu0 }
 0x5ef   :  { %v1671_v19 = vadd.f32 %v1670_v7, %v1469_v6  ;;  %v1672_v8 = vpop.f32.mrb[17].mxu0  ;;  %v3499_v6 = vld [vmem:[#allocation10 + $0x604] ss:$8 sps:$4 sm:$0xff]   ;;  %v3500_v7 = vld [vmem:[#allocation10 + $0x610] ss:$8 sps:$4 sm:$0xff]  }
 0x5f0   :  { %v1673_v45 = vadd.f32 %v1672_v8, %v1473_v18  ;;  %v1674_v9 = vpop.f32.mrb[18].mxu0  ;;  %v3502_v18 = vld [vmem:[#allocation10 + $0x614] ss:$8 sps:$4 sm:$0xff]   ;;  %2635 = vmatprep.subr.bf16.mxu0 %v3499_v6  ;;  %v3503_v8 = vld [vmem:[#allocation10 + $0x620] ss:$8 sps:$4 sm:$0xff]  }
 0x5f1   :  { %v1677_v10 = vmax.f32 %v1671_v19, 0.0  ;;  %v1675_v63 = vpop.f32.mrb[19].mxu0  ;;  %v3505_v19 = vld [vmem:[#allocation10 + $0x624] ss:$8 sps:$4 sm:$0xff]   ;;  %v3506_v9 = vld [vmem:[#allocation10 + $0x630] ss:$8 sps:$4 sm:$0xff]  }
 0x5f2   :  { %v1678_v11 = vmax.f32 %v1673_v45, 0.0  ;;  %v3508_v45 = vld [vmem:[#allocation10 + $0x634] ss:$8 sps:$4 sm:$0xff]   ;;  %v3509_v63 = vld [vmem:[#allocation10 + $0x640] ss:$8 sps:$4 sm:$0xff]  }
 0x5f3   :  { %v1679_v13 = vpack.c.bf16 %v1677_v10, %v1677_v10  ;;  %v3511_v10 = vld [vmem:[#allocation10 + $0x644] ss:$8 sps:$4 sm:$0xff]  }
 0x5f4   :  { %v1680_v12 = vpack.c.bf16 %v1678_v11, %v1678_v11  ;;  %v3514_v11 = vld [vmem:[#allocation10 + $0x654] ss:$8 sps:$4 sm:$0xff]  }
 0x5f6   :  { %1919 = vmatprep.mubr.bf16.mxu1 %v1680_v12  ;;  %v3512_v12 = vld [vmem:[#allocation10 + $0x650] ss:$8 sps:$4 sm:$0xff]  }
 0x5f7   :  { %1920 = vmatmul.mubr.bf16.vlgmr.msra.gmra.mrb[16].mxu1 %v1679_v13  ;;  %v3517_v13 = vld [vmem:[#allocation10 + $0x664] ss:$8 sps:$4 sm:$0xff]  }
 0x5f8   :  { %2390 = vmatpush1.bf16.msra.mxu1 %v3449_v20  ;;  %v3521_v20 = vld [vmem:[#allocation10 + $0x680] ss:$8 sps:$4 sm:$0xff]  }
 0x5f9   :  { %2391 = vmatprep.subr.bf16.mxu1 %v3454_v22  ;;  %v3524_v22 = vld [vmem:[#allocation10 + $0x690] ss:$8 sps:$4 sm:$0xff]  }
 0x5fc   :  { %2392 = vmatpush1.bf16.msra.mxu1 %v3452_v23  ;;  %v3529_v23 = vld [vmem:[#allocation10 + $0x6a4] ss:$8 sps:$4 sm:$0xff]  }
 0x5fd   :  { %2393 = vmatprep.subr.bf16.mxu1 %v3457_v24  ;;  %v3527_v24 = vld [vmem:[#allocation10 + $0x6a0] ss:$8 sps:$4 sm:$0xff]  }
 0x600   :  { %2394 = vmatpush1.bf16.msra.mxu1 %v3455_v26  ;;  %v3532_v26 = vld [vmem:[#allocation10 + $0x6b4] ss:$8 sps:$4 sm:$0xff]  }
 0x601   :  { %2395 = vmatprep.subr.bf16.mxu1 %v3460_v27  ;;  %v3530_v27 = vld [vmem:[#allocation10 + $0x6b0] ss:$8 sps:$4 sm:$0xff]  }
 0x604   :  { %2396 = vmatpush1.bf16.msra.mxu1 %v3458_v28  ;;  %v3535_v28 = vld [vmem:[#allocation10 + $0x6c4] ss:$8 sps:$4 sm:$0xff]  }
 0x605   :  { %2397 = vmatprep.subr.bf16.mxu1 %v3463_v29  ;;  %v3533_v29 = vld [vmem:[#allocation10 + $0x6c0] ss:$8 sps:$4 sm:$0xff]  }
 0x608   :  { %2398 = vmatpush1.bf16.msra.mxu1 %v3461_v32  ;;  %v3538_v32 = vld [vmem:[#allocation10 + $0x6d4] ss:$8 sps:$4 sm:$0xff]  }
 0x609   :  { %2399 = vmatprep.subr.bf16.mxu1 %v3466_v33  ;;  %v3536_v33 = vld [vmem:[#allocation10 + $0x6d0] ss:$8 sps:$4 sm:$0xff]  }
 0x60c   :  { %2400 = vmatpush1.bf16.msra.mxu1 %v3464_v37  ;;  %v2950_v37 = vld [vmem:[%s4100_s5 + $0x4] ss:$8 sm:$0x3] }
 0x60d   :  { %2401 = vmatprep.subr.bf16.mxu1 %v3469_v36  ;;  %v1971_v36 = vrot.slane %v2950_v37, %v3957_v35 }
 0x610   :  { %2402 = vmatpush1.bf16.msra.mxu1 %v3467_v0  ;;  %v1975_v0 = vrot.slane %v2950_v37, %v3954_v34 }
 0x611   :  { %2403 = vmatprep.subr.bf16.mxu1 %v3472_v30 }
 0x614   :  { %2404 = vmatpush1.bf16.msra.mxu1 %v3470_v31 }
 0x615   :  { %2405 = vmatprep.subr.bf16.mxu1 %v3475_v38 }
 0x618   :  { %2406 = vmatpush1.bf16.msra.mxu1 %v3473_v39 }
 0x619   :  { %2407 = vmatprep.subr.bf16.mxu1 %v3478_v40 }
 0x61c   :  { %2408 = vmatpush1.bf16.msra.mxu1 %v3476_v41 }
 0x61d   :  { %2409 = vmatprep.subr.bf16.mxu1 %v3481_v44 }
 0x620   :  { %2410 = vmatpush1.bf16.msra.mxu1 %v3479_v46 }
 0x621   :  { %2411 = vmatprep.subr.bf16.mxu1 %v3484_v47 }
 0x624   :  { %2412 = vmatpush1.bf16.msra.mxu1 %v3482_v48 }
 0x625   :  { %2413 = vmatprep.subr.bf16.mxu1 %v3487_v49  ;;  %v3541_v49 = vld [vmem:[#allocation10 + $0x6e4] ss:$8 sps:$4 sm:$0xff]  }
 0x628   :  { %2414 = vmatpush1.bf16.msra.mxu1 %v3485_v50  ;;  %v3539_v50 = vld [vmem:[#allocation10 + $0x6e0] ss:$8 sps:$4 sm:$0xff]  }
 0x629   :  { %2415 = vmatprep.subr.bf16.mxu1 %v3490_v51  ;;  %v3544_v51 = vld [vmem:[#allocation10 + $0x6f4] ss:$8 sps:$4 sm:$0xff]  }
 0x62c   :  { %2416 = vmatpush1.bf16.msra.mxu1 %v3488_v52  ;;  %v3542_v52 = vld [vmem:[#allocation10 + $0x6f0] ss:$8 sps:$4 sm:$0xff]  }
 0x62d   :  { %2417 = vmatprep.subr.bf16.mxu1 %v3493_v1 }
 0x630   :  { %2418 = vmatpush1.bf16.msra.mxu1 %v3491_v43 }
 0x631   :  { %2419 = vmatprep.subr.bf16.mxu1 %v3496_v2 }
 0x634   :  { %2420 = vmatpush1.bf16.msra.mxu1 %v3494_v3 }
 0x6ca   :  { %v1921_v25 = vpop.f32.mrb[16].mxu1 }
 0x6cb   :  { %v1922_v55 = vadd.f32 %v1921_v25, %v1720_v53  ;;  %v1923_v56 = vpop.f32.mrb[17].mxu1  ;;  %v2222_v53 = vrot.slane %v2983_v4, %v3957_v35 }
 0x6cc   :  { %v1924_v42 = vadd.f32 %v1923_v56, %v1724_v54  ;;  %v1925_v57 = vpop.f32.mrb[18].mxu1  ;;  %v2226_v54 = vrot.slane %v2983_v4, %v3954_v34 }
 0x6cd   :  { %v1928_v58 = vmax.f32 %v1922_v55, 0.0  ;;  %v1926_v59 = vpop.f32.mrb[19].mxu1 }
 0x6ce   :  { %v1929_v60 = vmax.f32 %v1924_v42, 0.0 }
 0x6cf   :  { %v1930_v62 = vpack.c.bf16 %v1928_v58, %v1928_v58 }
 0x6d0   :  { %v1931_v61 = vpack.c.bf16 %v1929_v60, %v1929_v60 }
 0x6d2   :  { %2170 = vmatprep.mubr.bf16.mxu0 %v1931_v61 }
 0x6d3   :  { %2171 = vmatmul.mubr.bf16.vlgmr.msra.gmra.mrb[20].mxu0 %v1930_v62 }
 0x6d4   :  { %2636 = vmatpush1.bf16.msra.mxu0 %v3497_v5 }
 0x6d5   :  { %2637 = vmatprep.subr.bf16.mxu0 %v3502_v18 }
 0x6d8   :  { %2638 = vmatpush1.bf16.msra.mxu0 %v3500_v7 }
 0x6d9   :  { %2639 = vmatprep.subr.bf16.mxu0 %v3505_v19 }
 0x6dc   :  { %2640 = vmatpush1.bf16.msra.mxu0 %v3503_v8 }
 0x6dd   :  { %2641 = vmatprep.subr.bf16.mxu0 %v3508_v45 }
 0x6e0   :  { %2642 = vmatpush1.bf16.msra.mxu0 %v3506_v9 }
 0x6e1   :  { %2643 = vmatprep.subr.bf16.mxu0 %v3511_v10 }
 0x6e4   :  { %2644 = vmatpush1.bf16.msra.mxu0 %v3509_v63 }
 0x6e5   :  { %2645 = vmatprep.subr.bf16.mxu0 %v3514_v11 }
 0x6e8   :  { %2646 = vmatpush1.bf16.msra.mxu0 %v3512_v12 }
 0x6e9   :  { %2647 = vmatprep.subr.bf16.mxu0 %v3517_v13 }
 0x6ec   :  { %2648 = vmatpush1.bf16.msra.mxu0 %v3515_v14 }
 0x6ed   :  { %2649 = vmatprep.subr.bf16.mxu0 %v3520_v15 }
 0x6f0   :  { %2650 = vmatpush1.bf16.msra.mxu0 %v3518_v16 }
 0x6f1   :  { %2651 = vmatprep.subr.bf16.mxu0 %v3523_v17 }
 0x6f4   :  { %2652 = vmatpush1.bf16.msra.mxu0 %v3521_v20 }
 0x6f5   :  { %2653 = vmatprep.subr.bf16.mxu0 %v3526_v21 }
 0x6f8   :  { %2654 = vmatpush1.bf16.msra.mxu0 %v3524_v22 }
 0x6f9   :  { %2655 = vmatprep.subr.bf16.mxu0 %v3529_v23 }
 0x6fc   :  { %2656 = vmatpush1.bf16.msra.mxu0 %v3527_v24 }
 0x6fd   :  { %2657 = vmatprep.subr.bf16.mxu0 %v3532_v26 }
 0x700   :  { %2658 = vmatpush1.bf16.msra.mxu0 %v3530_v27 }
 0x701   :  { %2659 = vmatprep.subr.bf16.mxu0 %v3535_v28 }
 0x704   :  { %2660 = vmatpush1.bf16.msra.mxu0 %v3533_v29 }
 0x705   :  { %2661 = vmatprep.subr.bf16.mxu0 %v3538_v32 }
 0x708   :  { %2662 = vmatpush1.bf16.msra.mxu0 %v3536_v33 }
 0x709   :  { %2663 = vmatprep.subr.bf16.mxu0 %v3541_v49 }
 0x70c   :  { %2664 = vmatpush1.bf16.msra.mxu0 %v3539_v50 }
 0x70d   :  { %2665 = vmatprep.subr.bf16.mxu0 %v3544_v51 }
 0x710   :  { %2666 = vmatpush1.bf16.msra.mxu0 %v3542_v52 }
 0x7a6   :  { %v2172_v30 = vpop.f32.mrb[20].mxu0 }
 0x7a7   :  { %v2173_v31 = vadd.f32 %v2172_v30, %v1971_v36  ;;  %v2174_v38 = vpop.f32.mrb[21].mxu0 }
 0x7a8   :  { %v2175_v39 = vadd.f32 %v2174_v38, %v1975_v0  ;;  %v2176_v40 = vpop.f32.mrb[22].mxu0 }
 0x7a9   :  { %v2179_v41 = vmax.f32 %v2173_v31, 0.0  ;;  %v2177_v44 = vpop.f32.mrb[23].mxu0 }
 0x7aa   :  { %v2180_v46 = vmax.f32 %v2175_v39, 0.0 }
 0x7ab   :  { %v2181_v48 = vpack.c.bf16 %v2179_v41, %v2179_v41 }
 0x7ac   :  { %v2182_v47 = vpack.c.bf16 %v2180_v46, %v2180_v46 }
 0x7ae   :  { %2421 = vmatprep.mubr.bf16.mxu1 %v2182_v47 }
 0x7af   :  { %2422 = vmatmul.mubr.bf16.vlgmr.msra.gmra.mrb[20].mxu1 %v2181_v48 }
 0x882   :  { %v2423_v25 = vpop.f32.mrb[20].mxu1 }
 0x883   :  { %v2424_v55 = vadd.f32 %v2423_v25, %v2222_v53  ;;  %v2425_v56 = vpop.f32.mrb[21].mxu1 }
 0x884   :  { %v2426_v42 = vadd.f32 %v2425_v56, %v2226_v54  ;;  %v2427_v57 = vpop.f32.mrb[22].mxu1 }
 0x885   :  { %v2430_v58 = vmax.f32 %v2424_v55, 0.0  ;;  %v2428_v59 = vpop.f32.mrb[23].mxu1 }
 0x886   :  { %v2431_v60 = vmax.f32 %v2426_v42, 0.0 }
 0x887   :  { %v2432_v62 = vpack.c.bf16 %v2430_v58, %v2430_v58 }
 0x888   :  { %v2433_v61 = vpack.c.bf16 %v2431_v60, %v2431_v60 }
 0x88a   :  { %2667 = vmatprep.mubr.bf16.mxu0 %v2433_v61 }
 0x88b   :  { %2668 = vmatmul.mubr.bf16.vlgmr.msra.gmra.mrb[24].mxu0 %v2432_v62 }
 0x88c   :  { %3680 = shalt.err (!%p3677_p2)
}
 0x88d   :  { %s3681_s16 = scalar_lea.hbm %s4102_s7, 640 }
 0x88e   :  { %p3682_p3 = scmp.ne.s32.totalorder %s4102_s7, %s3681_s16  ;;  %p3685_p4 = scmp.lt.u32.totalorder %s3681_s16, %s4102_s7 }
 0x890   :  { %p3687_p5 = pnand %p3685_p4, %p3682_p3 }
 0x892   :  { %3690 = shalt.err (!%p3687_p5)
}
 0x893   :  { %2695 = dma.vmem_to_hbm [thread:$0]  %s2693_s24, 640, %s4102_s7, [#allocation13]  }
 0x894   :  { %s3691_s12 = scalar_lea.vmem %s2713_s26, 128  ;;  %p3696_p7 = scmp.lt.s32.totalorder %s2713_s26, %s2713_s26 }
 0x895   :  { %p3692_p6 = scmp.ne.s32.totalorder %s2713_s26, %s3691_s12  ;;  %p3697_p8 = scmp.lt.s32.totalorder %s3691_s12, %s3691_s12 }
 0x897   :  { %p3698_p9 = por %p3697_p8, %p3696_p7 }
 0x899   :  { %p3699_p10 = pnand %p3698_p9, %p3692_p6 }
 0x89b   :  { %3702 = shalt.err (!%p3699_p10)
}
 0x89c   :  { %s3703_s17 = scalar_lea.hbm %s4104_s9, 128 }
 0x89d   :  { %p3704_p11 = scmp.ne.s32.totalorder %s4104_s9, %s3703_s17  ;;  %p3707_p12 = scmp.lt.u32.totalorder %s3703_s17, %s4104_s9 }
 0x89f   :  { %p3709_p13 = pnand %p3707_p12, %p3704_p11 }
 0x8a1   :  { %3712 = shalt.err (!%p3709_p13)
}
 0x8a2   :  { %2715 = dma.vmem_to_hbm [thread:$0]  %s2713_s26, 128, %s4104_s9, [#allocation16]  }
 0x8a3   :  { %s3809_s20 = smov [#allocation14]  }
 0x8a4   :  { %s2702_s22 = sshll.u32 %s3809_s20, 4  ;;  %s2703_s22 = int_to_ptr.vmem [resolvable:$true] %s2702_s22 }
 0x8a5   :  { %s3713_s23 = scalar_lea.vmem %s2703_s22, 640  ;;  %p3718_p1 = scmp.lt.s32.totalorder %s2703_s22, %s2703_s22 }
 0x8a6   :  { %p3714_p0 = scmp.ne.s32.totalorder %s2703_s22, %s3713_s23  ;;  %p3719_p2 = scmp.lt.s32.totalorder %s3713_s23, %s3713_s23 }
 0x8a8   :  { %p3720_p3 = por %p3719_p2, %p3718_p1 }
 0x8aa   :  { %p3721_p4 = pnand %p3720_p3, %p3714_p0 }
 0x8ac   :  { %3724 = shalt.err (!%p3721_p4)
}
 0x8ad   :  { %s3725_s27 = scalar_lea.hbm %s4103_s8, 640 }
 0x8ae   :  { %p3726_p5 = scmp.ne.s32.totalorder %s4103_s8, %s3725_s27  ;;  %p3729_p6 = scmp.lt.u32.totalorder %s3725_s27, %s4103_s8 }
 0x8b0   :  { %p3731_p7 = pnand %p3729_p6, %p3726_p5 }
 0x8b2   :  { %3734 = shalt.err (!%p3731_p7)
}
 0x8b3   :  { %2705 = dma.vmem_to_hbm [thread:$0]  %s2703_s22, 640, %s4103_s8, [#allocation13]  }
 0x8b4   :  { %s3810_s2 = smov [#allocation17]  }
 0x8b5   :  { %s2722_s21 = sshll.u32 %s3810_s2, 4  ;;  %s2723_s21 = int_to_ptr.vmem [resolvable:$true] %s2722_s21 }
 0x8b6   :  { %s3735_s30 = scalar_lea.vmem %s2723_s21, 128  ;;  %p3740_p9 = scmp.lt.s32.totalorder %s2723_s21, %s2723_s21 }
 0x8b7   :  { %p3736_p8 = scmp.ne.s32.totalorder %s2723_s21, %s3735_s30  ;;  %p3741_p10 = scmp.lt.s32.totalorder %s3735_s30, %s3735_s30 }
 0x8b9   :  { %p3742_p11 = por %p3741_p10, %p3740_p9 }
 0x8bb   :  { %p3743_p12 = pnand %p3742_p11, %p3736_p8 }
 0x8bd   :  { %3746 = shalt.err (!%p3743_p12)
}
 0x8be   :  { %s3747_s12 = scalar_lea.hbm %s4105_s10, 128 }
 0x8bf   :  { %p3748_p13 = scmp.ne.s32.totalorder %s4105_s10, %s3747_s12  ;;  %p3751_p0 = scmp.lt.u32.totalorder %s3747_s12, %s4105_s10 }
 0x8c1   :  { %p3753_p1 = pnand %p3751_p0, %p3748_p13 }
 0x8c3   :  { %3756 = shalt.err (!%p3753_p1)
}
 0x8c4   :  { %2725 = dma.vmem_to_hbm [thread:$0]  %s2723_s21, 128, %s4105_s10, [#allocation16]   ;;  %v3016_v34 = vld [vmem:[%s4100_s5 + $0x6] ss:$8 sm:$0x3] }
 0x8c5   :  { %v2473_v1 = vrot.slane %v3016_v34, %v3957_v35  ;;  %s3811_s7 = smov [#allocation11]  }
 0x8c6   :  { %s2682_s19 = sshll.u32 %s3811_s7, 4  ;;  %s2683_s19 = int_to_ptr.vmem [resolvable:$true] %s2682_s19 }
 0x8c7   :  { %s3757_s20 = scalar_lea.vmem %s2683_s19, 128  ;;  %p3762_p3 = scmp.lt.s32.totalorder %s2683_s19, %s2683_s19 }
 0x8c8   :  { %p3758_p2 = scmp.ne.s32.totalorder %s2683_s19, %s3757_s20  ;;  %p3763_p4 = scmp.lt.s32.totalorder %s3757_s20, %s3757_s20 }
 0x8ca   :  { %p3764_p5 = por %p3763_p4, %p3762_p3 }
 0x8cc   :  { %p3765_p6 = pnand %p3764_p5, %p3758_p2 }
 0x95e   :  { %v2669_v43 = vpop.f32.mrb[24].mxu0 }
 0x95f   :  { %v2670_v2 = vadd.f32 %v2669_v43, %v2473_v1  ;;  %v2671_v3 = vpop.f32.mrb[25].mxu0 }
 0x960   :  { %v2672_v5 = vpop.f32.mrb[26].mxu0 }
 0x961   :  { %2675 = vst [vmem:[#allocation11] sm:$0xff] %v2670_v2  ;;  %v2673_v6 = vpop.f32.mrb[27].mxu0 }
 0x962   :  { %3768 = shalt.err (!%p3765_p6)
}
 0x963   :  { %s3769_s22 = scalar_lea.hbm %s4101_s6, 128 }
 0x964   :  { %p3770_p7 = scmp.ne.s32.totalorder %s4101_s6, %s3769_s22  ;;  %p3773_p8 = scmp.lt.u32.totalorder %s3769_s22, %s4101_s6 }
 0x966   :  { %p3775_p9 = pnand %p3773_p8, %p3770_p7 }
 0x968   :  { %3778 = shalt.err (!%p3775_p9)
}
 0x969   :  { %2685 = dma.vmem_to_hbm [thread:$0]  %s2683_s19, 128, %s4101_s6, [#allocation4]  }
 0x96a   :  { %3785 = dma.done.wait [#allocation4], 128  }
 0x96b   :  { %3786 = vsyncadd [#allocation4], 4294967168 }
 0x96c   :  { %3787 = dma.done.wait [#allocation13], 1280  }
 0x96d   :  { %3788 = vsyncadd [#allocation13], 4294966016 }
 0x96e   :  { %3789 = dma.done.wait [#allocation16], 256  }
 0x96f   :  { %3790 = vsyncadd [#allocation16], 4294967040 }
 0x970   :  { %2741 = vsyncpa [#allocation3], 1 }
 0x971   :  { %2742 = vsyncpa [#allocation6], 1 }
 0x972   :  { %2743 = vsyncpa [#allocation9], 1 }
 0x973   :  { %2744 = vsyncpa [#allocation4], 1 }
 0x974   :  { %2745 = vsyncpa [#allocation13], 1 }
 0x975   :  { %2746 = vsyncpa [#allocation16], 1 }

</bundles_post_ra>
